<compile_context>
chip_gen: v5e
topology: v5e:2x2
jax: 0.10.0
libtpu: 0.0.40
codegen_flags: <defaults>
</compile_context>

<pallas_src>
import numpy as np
from functools import partial

import jax
import jax.numpy as jnp
from jax.experimental import pallas as pl
from jax.experimental.pallas import tpu as pltpu

# ----------------------------------------------------------------------------
# Host-side audio preprocessing (identical numpy math to the original module).
# This runs on CPU in the original code too (before the tensor hits the GPU).
# TODO(synk): the resampy.resample branch (sr != 16384) has no Pallas
#             equivalent and is not implemented.
# ----------------------------------------------------------------------------
_MEL_BREAK_FREQUENCY_HERTZ = 700.0
_MEL_HIGH_FREQUENCY_Q = 1127.0


def hertz_to_mel(frequencies_hertz):
    return _MEL_HIGH_FREQUENCY_Q * np.log(
        1.0 + frequencies_hertz / _MEL_BREAK_FREQUENCY_HERTZ)


def spectrogram_to_mel_matrix(num_mel_bins=20, num_spectrogram_bins=129,
                              audio_sample_rate=8000, lower_edge_hertz=125.0,
                              upper_edge_hertz=3800.0):
    nyquist_hertz = audio_sample_rate / 2.0
    spectrogram_bins_hertz = np.linspace(0.0, nyquist_hertz, num_spectrogram_bins)
    spectrogram_bins_mel = hertz_to_mel(spectrogram_bins_hertz)
    band_edges_mel = np.linspace(hertz_to_mel(lower_edge_hertz),
                                 hertz_to_mel(upper_edge_hertz),
                                 num_mel_bins + 2)
    mel_weights_matrix = np.empty((num_spectrogram_bins, num_mel_bins))
    for i in range(num_mel_bins):
        lower_edge_mel, center_mel, upper_edge_mel = band_edges_mel[i:i + 3]
        lower_slope = (spectrogram_bins_mel - lower_edge_mel) / (center_mel - lower_edge_mel)
        upper_slope = (upper_edge_mel - spectrogram_bins_mel) / (upper_edge_mel - center_mel)
        mel_weights_matrix[:, i] = np.maximum(0.0, np.minimum(lower_slope, upper_slope))
    mel_weights_matrix[0, :] = 0.0
    return mel_weights_matrix


def frame(data, window_length, hop_length):
    num_samples = data.shape[0]
    num_frames = 1 + int(np.floor((num_samples - window_length) / hop_length))
    shape = (num_frames, window_length) + data.shape[1:]
    strides = (data.strides[0] * hop_length,) + data.strides
    return np.lib.stride_tricks.as_strided(data, shape=shape, strides=strides)


def periodic_hann(window_length):
    return 0.5 - 0.5 * np.cos(2 * np.pi / window_length * np.arange(window_length))


def stft_magnitude(signal, fft_length, hop_length=None, window_length=None):
    frames = frame(signal, window_length, hop_length)
    window = periodic_hann(window_length)
    windowed_frames = frames * window
    return np.abs(np.fft.rfft(windowed_frames, int(fft_length)))


def log_mel_spectrogram(data, audio_sample_rate=8000, log_offset=0.0,
                        window_length_secs=0.025, hop_length_secs=0.01, **kwargs):
    window_length_samples = int(round(audio_sample_rate * window_length_secs))
    hop_length_samples = int(round(audio_sample_rate * hop_length_secs))
    fft_length = 2 ** int(np.ceil(np.log(window_length_samples) / np.log(2.0)))
    spectrogram = stft_magnitude(data, fft_length=fft_length,
                                 hop_length=hop_length_samples,
                                 window_length=window_length_samples)
    mel_spectrogram = np.dot(
        spectrogram,
        spectrogram_to_mel_matrix(num_spectrogram_bins=spectrogram.shape[1],
                                  audio_sample_rate=audio_sample_rate, **kwargs))
    return np.log(mel_spectrogram + log_offset)


def _preprocess(data, sample_rate):
    NUM_BANDS = 64
    SAMPLE_RATE = 16384
    STFT_WINDOW_LENGTH_SECONDS = 0.025
    STFT_HOP_LENGTH_SECONDS = 0.01
    MEL_MIN_HZ = 125
    MEL_MAX_HZ = 7500
    LOG_OFFSET = 0.01
    EXAMPLE_WINDOW_SECONDS = 0.96
    EXAMPLE_HOP_SECONDS = 0.96
    if len(data.shape) > 1:
        data = np.mean(data, axis=1)
    assert sample_rate == SAMPLE_RATE, "resampling path not supported (resampy)"
    log_mel = log_mel_spectrogram(
        data, audio_sample_rate=SAMPLE_RATE, log_offset=LOG_OFFSET,
        window_length_secs=STFT_WINDOW_LENGTH_SECONDS,
        hop_length_secs=STFT_HOP_LENGTH_SECONDS, num_mel_bins=NUM_BANDS,
        lower_edge_hertz=MEL_MIN_HZ, upper_edge_hertz=MEL_MAX_HZ)
    features_sample_rate = 1.0 / STFT_HOP_LENGTH_SECONDS
    example_window_length = int(round(EXAMPLE_WINDOW_SECONDS * features_sample_rate))
    example_hop_length = int(round(EXAMPLE_HOP_SECONDS * features_sample_rate))
    num_samples = log_mel.shape[0]
    num_frames = int(np.round((num_samples - example_window_length) / example_hop_length))
    shape = (num_frames, example_window_length) + log_mel.shape[1:]
    strides = (log_mel.strides[0] * example_hop_length,) + log_mel.strides
    log_mel_examples = np.lib.stride_tricks.as_strided(log_mel, shape=shape,
                                                       strides=strides)
    # torch.tensor(...)[:, None].float()  ->  (N, 1, 96, 64) float32
    return np.ascontiguousarray(log_mel_examples)[:, None, :, :].astype(np.float32)


# ----------------------------------------------------------------------------
# Pallas kernels
# ----------------------------------------------------------------------------
_VMEM_LIMIT = 32 * 1024 * 1024   # <= default scoped limit on v6e/v7x, < v5e physical


def _ceil_mult(x, m):
    return ((x + m - 1) // m) * m


def _compiler_params(dim_sem):
    return pltpu.CompilerParams(dimension_semantics=dim_sem,
                                vmem_limit_bytes=_VMEM_LIMIT)


# ---- fused matmul + bias (+ReLU) -------------------------------------------
def _mm_bias_act_kernel(relu, a_ref, w_ref, b_ref, o_ref, acc_ref):
    @pl.when(pl.program_id(2) == 0)
    def _init():
        acc_ref[...] = jnp.zeros_like(acc_ref)

    a = a_ref[...]
    if a.dtype != w_ref.dtype:          # bf16 weights -> native bf16 MXU path
        a = a.astype(w_ref.dtype)
    acc_ref[...] += jnp.dot(a, w_ref[...], preferred_element_type=jnp.float32)

    @pl.when(pl.program_id(2) == pl.num_programs(2) - 1)
    def _fin():
        r = acc_ref[...] + b_ref[...]
        if relu:
            r = jnp.maximum(r, 0.0)
        o_ref[...] = r.astype(o_ref.dtype)


def matmul_bias_relu(a, w, b, relu=True, tm=512, tn=1024, tk=1024):
    """Fused (a @ w + b) with optional ReLU.  a:(M,K), w:(K,N), b:(N,).

    Tile sizes adapt to the problem: tiny M (e.g. the B*N=2 FC inputs) only
    pads to the 8-sublane minimum, and K/N below 128 use a full-extent block
    instead of being zero-padded to 128 (legal when the block equals the full
    array dim)."""
    M, K = a.shape
    _, N = w.shape

    Mp = _ceil_mult(M, 8)
    tm = min(tm, Mp)
    Mp = _ceil_mult(Mp, tm)

    if K < 128:
        tk, Kp = K, K
    else:
        Kp = _ceil_mult(K, 128)
        tk = min(tk, Kp)
        Kp = _ceil_mult(Kp, tk)

    if N < 128:
        tn, Np = N, N
    else:
        Np = _ceil_mult(N, 128)
        tn = min(tn, Np)
        Np = _ceil_mult(Np, tn)

    a_p = jnp.pad(a, ((0, Mp - M), (0, Kp - K))) if (Mp > M or Kp > K) else a
    w_p = jnp.pad(w, ((0, Kp - K), (0, Np - N))) if (Kp > K or Np > N) else w
    b_p = (jnp.pad(b, (0, Np - N)) if Np > N else b).reshape(1, Np)

    out = pl.pallas_call(
        partial(_mm_bias_act_kernel, relu),
        out_shape=jax.ShapeDtypeStruct((Mp, Np), jnp.float32),
        grid_spec=pltpu.PrefetchScalarGridSpec(
            num_scalar_prefetch=0,
            grid=(Mp // tm, Np // tn, Kp // tk),
            in_specs=[
                pl.BlockSpec((tm, tk), lambda i, j, k: (i, k)),
                pl.BlockSpec((tk, tn), lambda i, j, k: (k, j)),
                pl.BlockSpec((1, tn), lambda i, j, k: (0, j)),
            ],
            out_specs=pl.BlockSpec((tm, tn), lambda i, j, k: (i, j)),
            scratch_shapes=[pltpu.VMEM((tm, tn), jnp.float32)],
        ),
        compiler_params=_compiler_params(("parallel", "parallel", "arbitrary")),
    )(a_p, w_p, b_p)
    if Mp > M or Np > N:
        out = out[:M, :N]
    return out


# ---- fused 3x3 conv + bias + ReLU with in-kernel im2col ---------------------
def _conv3x3_kernel(P, x_ref, w_ref, b_ref, o_ref, acc_ref):
    # x_ref: (1, (H+3)*P, Cin) zero-padded flattened image; P = W + 2
    # w_ref: (9, Cin, Cout) ; b_ref: (1, Cout)
    # o_ref: (1, H*P, Cout) ; acc_ref: (H*P, Cout) f32
    M = acc_ref.shape[0]
    acc_ref[...] = jnp.zeros_like(acc_ref)
    for dh in range(3):
        for dw in range(3):
            a = x_ref[0, pl.ds(dh * P + dw, M), :]
            if a.dtype != w_ref.dtype:
                a = a.astype(w_ref.dtype)
            acc_ref[...] += jnp.dot(a, w_ref[dh * 3 + dw],
                                    preferred_element_type=jnp.float32)
    o_ref[0] = jnp.maximum(acc_ref[...] + b_ref[...], 0.0)


def conv3x3_relu(x, w9, b):
    """3x3 / stride 1 / pad 1 conv + ReLU, im2col fused into the kernel.

    x: (n, H, W, Cin) float32 NHWC.  w9: (9, Cin, Cout).  b: (Cout,).
    Returns (n, H, W+2, Cout) float32 where only columns [0, W) are valid;
    columns W, W+1 hold finite junk that downstream consumers slice/ignore.
    """
    n, H, W, Cin = x.shape
    Cout = w9.shape[2]
    P = W + 2
    R = (H + 3) * P                 # extra zero row keeps every shifted read in-bounds
    M = H * P
    xp = jnp.pad(x, ((0, 0), (1, 2), (1, 1), (0, 0)))
    xf = xp.reshape(n, R, Cin)      # free reshape
    out = pl.pallas_call(
        partial(_conv3x3_kernel, P),
        out_shape=jax.ShapeDtypeStruct((n, M, Cout), jnp.float32),
        grid_spec=pltpu.PrefetchScalarGridSpec(
            num_scalar_prefetch=0,
            grid=(n,),
            in_specs=[
                pl.BlockSpec((1, R, Cin), lambda i: (i, 0, 0)),
                pl.BlockSpec((9, Cin, Cout), lambda i: (0, 0, 0)),
                pl.BlockSpec((1, Cout), lambda i: (0, 0)),
            ],
            out_specs=pl.BlockSpec((1, M, Cout), lambda i: (i, 0, 0)),
            scratch_shapes=[pltpu.VMEM((M, Cout), jnp.float32)],
        ),
        compiler_params=_compiler_params(("parallel",)),
    )(xf, w9, b.reshape(1, Cout))
    return out.reshape(n, H, P, Cout)


def conv1_im2col_relu(x, w9, b):
    """First conv (Cin=1): tiny K=9 im2col (NO padding of K) + fused MXU matmul."""
    n, H, W, _ = x.shape
    cout = w9.shape[2]
    xp = jnp.pad(x[..., 0], ((0, 0), (1, 1), (1, 1)))
    patches = [xp[:, dh:dh + H, dw:dw + W] for dh in range(3) for dw in range(3)]
    cols = jnp.stack(patches, axis=-1).reshape(n * H * W, 9)
    y = matmul_bias_relu(cols, w9.reshape(9, cout), b, relu=True)
    return y.reshape(n, H, W, cout)


# ---- fused 2x2 maxpool + mean-over-W ----------------------------------------
def _pool_mean_kernel(w2, x_ref, o_ref, m_ref):
    # x_ref: (1, h2, 2, p2, 2C)   o_ref: (1, h2, w2, C)   m_ref: (1, h2, C)
    c = o_ref.shape[3]
    r0 = x_ref[0, :, 0, :, :]                 # even rows   (h2, p2, 2C)
    r1 = x_ref[0, :, 1, :, :]                 # odd rows
    m = jnp.maximum(r0, r1)
    m = m[:, :w2, :]                          # drop junk column-group (if any)
    pooled = jnp.maximum(m[:, :, :c], m[:, :, c:])   # max over the W pair
    o_ref[0] = pooled
    m_ref[0] = jnp.mean(pooled, axis=1)       # mean over pooled width


def maxpool2x2_and_mean(x, valid_w):
    """MaxPool2d(2,2) + mean-over-W, reading the feature map once.

    x: (n, H, P, C) float32 where only columns [0, valid_w) are valid.
    Returns (pooled (n, H//2, valid_w//2, C), mean (n, H//2, C))."""
    n, H, P, C = x.shape
    h2, w2, p2 = H // 2, valid_w // 2, P // 2
    xr = x.reshape(n, h2, 2, p2, 2 * C)       # free reshape: rows paired, (w,c)->lanes
    return pl.pallas_call(
        partial(_pool_mean_kernel, w2),
        out_shape=(jax.ShapeDtypeStruct((n, h2, w2, C), jnp.float32),
                   jax.ShapeDtypeStruct((n, h2, C), jnp.float32)),
        grid_spec=pltpu.PrefetchScalarGridSpec(
            num_scalar_prefetch=0,
            grid=(n,),
            in_specs=[pl.BlockSpec((1, h2, 2, p2, 2 * C),
                                   lambda i: (i, 0, 0, 0, 0))],
            out_specs=(pl.BlockSpec((1, h2, w2, C), lambda i: (i, 0, 0, 0)),
                       pl.BlockSpec((1, h2, C), lambda i: (i, 0, 0))),
        ),
        compiler_params=_compiler_params(("parallel",)),
    )(xr)


# ----------------------------------------------------------------------------
# Parameters (deterministic synthetic init; VGGish shapes, bf16 weights)
# ----------------------------------------------------------------------------
def init_params(key):
    ks = jax.random.split(key, 9)

    def conv(k, cin, cout):
        w = jax.random.normal(k, (3, 3, cin, cout), jnp.float32) * np.sqrt(2.0 / (9 * cin))
        # stored (9, cin, cout) bf16: halves HBM weight bytes; accumulation stays f32.
        return w.reshape(9, cin, cout).astype(jnp.bfloat16), jnp.zeros((cout,), jnp.float32)

    def lin(k, fin, fout):
        w = jax.random.normal(k, (fin, fout), jnp.float32) * np.sqrt(2.0 / fin)
        return w.astype(jnp.bfloat16), jnp.zeros((fout,), jnp.float32)

    return {
        "c1": conv(ks[0], 1, 64),
        "c2": conv(ks[1], 64, 128),
        "c3a": conv(ks[2], 128, 256),
        "c3b": conv(ks[3], 256, 256),
        "c4a": conv(ks[4], 256, 512),
        "c4b": conv(ks[5], 512, 512),
        "fc1": lin(ks[6], 512 * 4 * 6, 4096),
        "fc2": lin(ks[7], 4096, 4096),
        "fc3": lin(ks[8], 4096, 128),
    }


# ----------------------------------------------------------------------------
# LayerVggish forward (device side)
# ----------------------------------------------------------------------------
def _network_forward(x5, params, fps=24):
    B, N = x5.shape[0], x5.shape[1]
    x = x5.reshape(B * N, 1, 96, 64)
    x = jnp.transpose(x, (0, 2, 3, 1))                     # NCHW -> NHWC (BN,96,64,1)

    means = []
    # block 1
    y = conv1_im2col_relu(x, *params["c1"])                # (BN,96,64,64)
    x, m = maxpool2x2_and_mean(y, valid_w=y.shape[2]); means.append(m)
    # block 2
    w_in = x.shape[2]
    y = conv3x3_relu(x, *params["c2"])                     # (BN,48,34,128)
    x, m = maxpool2x2_and_mean(y, valid_w=w_in); means.append(m)
    # block 3
    w_in = x.shape[2]
    y = conv3x3_relu(x, *params["c3a"])[:, :, :w_in, :]
    y = conv3x3_relu(y, *params["c3b"])                    # (BN,24,18,256)
    x, m = maxpool2x2_and_mean(y, valid_w=w_in); means.append(m)
    # block 4
    w_in = x.shape[2]
    y = conv3x3_relu(x, *params["c4a"])[:, :, :w_in, :]
    y = conv3x3_relu(y, *params["c4b"])                    # (BN,12,10,512)
    x, m = maxpool2x2_and_mean(y, valid_w=w_in); means.append(m)   # x: (BN,6,4,512)

    outs = []
    for m in means:
        H, C = m.shape[1], m.shape[2]
        idx = (np.arange(fps) * H) // fps                  # torch 'nearest' -> size fps
        outs.append(m[:, idx, :].reshape(B, N * fps, C))   # '(b n) c t -> b (n t) c'

    # last feature map flattened in (H, W, C) order == torch transpose/transpose/view
    e = x.reshape(B * N, -1)                               # (BN, 6*4*512)
    e = matmul_bias_relu(e, *params["fc1"], relu=True)
    e = matmul_bias_relu(e, *params["fc2"], relu=True)
    e = matmul_bias_relu(e, *params["fc3"], relu=True)     # (BN,128)
    emb = e.reshape(B, N, 128)
    idx = np.arange(fps * N) // fps                        # nearest interp N -> fps*N
    outs.append(emb[:, idx, :])
    return outs


_network_forward_jit = jax.jit(_network_forward)


def vggish_extractor_forward(audio_samples, params, sr=16384):
    """audio_samples: array-like (B, num_audio_samples) raw waveform."""
    batch = np.stack([_preprocess(np.asarray(a), sr) for a in audio_samples])
    return _network_forward_jit(jnp.asarray(batch), params)


# ----------------------------------------------------------------------------
if __name__ == "__main__":
    key = jax.random.PRNGKey(0)
    k_params, k_audio, k1, k2, k3, k4 = jax.random.split(key, 6)

    # 1) fused matmul kernel vs XLA
    A = jax.random.normal(k1, (200, 300), jnp.float32)
    W = jax.random.normal(k2, (300, 150), jnp.float32)
    bb = jnp.arange(150, dtype=jnp.float32) * 0.01
    got = matmul_bias_relu(A, W, bb, relu=False)
    ref = A @ W + bb
    np.testing.assert_allclose(np.asarray(got), np.asarray(ref), rtol=2e-2, atol=2e-2)

    # 2) fused conv3x3+ReLU kernel (in-kernel im2col) vs lax.conv
    xc = jax.random.normal(k3, (2, 8, 8, 16), jnp.float32)
    wc = jax.random.normal(k4, (9, 16, 32), jnp.float32) * 0.1
    bc = jnp.arange(32, dtype=jnp.float32) * 0.01
    got = conv3x3_relu(xc, wc, bc)[:, :, :8, :]
    ref = jnp.maximum(
        jax.lax.conv_general_dilated(
            xc, wc.reshape(3, 3, 16, 32), (1, 1), "SAME",
            dimension_numbers=("NHWC", "HWIO", "NHWC"),
            precision=jax.lax.Precision.HIGHEST) + bc, 0.0)
    np.testing.assert_allclose(np.asarray(got), np.asarray(ref), rtol=2e-2, atol=5e-2)

    # 3) fused maxpool2x2 + mean-over-W kernel vs XLA
    xq = jax.random.normal(k3, (2, 8, 8, 128), jnp.float32)
    pooled, meanw = maxpool2x2_and_mean(xq, valid_w=8)
    pref = xq.reshape(2, 4, 2, 4, 2, 128).max(axis=(2, 4))
    mref = pref.mean(axis=2)
    np.testing.assert_allclose(np.asarray(pooled), np.asarray(pref), rtol=1e-5, atol=1e-5)
    np.testing.assert_allclose(np.asarray(meanw), np.asarray(mref), rtol=1e-5, atol=1e-5)

    params = init_params(k_params)

    # 2 audio clips of 2 seconds @ 16384 Hz -> each yields N=1 VGGish example
    audio = np.asarray(jax.random.normal(k_audio, (2, 32768), jnp.float32))

    outputs = vggish_extractor_forward(audio, params, sr=16384)
    outputs = jax.block_until_ready(outputs)

    expected_channels = [64, 128, 256, 512, 128]
    B, N, fps = 2, 1, 24
    assert len(outputs) == 5
    for o, c in zip(outputs, expected_channels):
        assert o.shape == (B, fps * N, c), o.shape
        assert o.dtype == jnp.float32
        assert bool(jnp.all(jnp.isfinite(o)))

    print("KERNEL_OK")
</pallas_src>

<mosaic_0001>
module attributes {stable_mosaic.version = 11 : i64} {
  func.func @_mm_bias_act_kernel(%arg0: i32, %arg1: i32, %arg2: i32, %arg3: memref<200x384xf32, #tpu.memory_space<vmem>>, %arg4: memref<384x256xf32, #tpu.memory_space<vmem>>, %arg5: memref<1x256xf32, #tpu.memory_space<vmem>>, %arg6: memref<200x256xf32, #tpu.memory_space<vmem>>, %arg7: memref<200x256xf32, #tpu.memory_space<vmem>>) attributes {dimension_semantics = [#tpu.dimension_semantics<parallel>, #tpu.dimension_semantics<parallel>, #tpu.dimension_semantics<arbitrary>], iteration_bounds = array<i64: 1, 1, 1>, scalar_prefetch = 0 : i64, scratch_operands = 1 : i64, tpu.core_type = #tpu.core_type<tc>, window_params = [{transform_indices = @transform_0, window_bounds = array<i64: 200, 384>}, {transform_indices = @transform_1, window_bounds = array<i64: 384, 256>}, {transform_indices = @transform_2, window_bounds = array<i64: 1, 256>}, {transform_indices = @transform_3, window_bounds = array<i64: 200, 256>}]} {
    %c0_i32 = arith.constant 0 : i32
    %0 = arith.cmpi eq, %arg2, %c0_i32 : i32
    %1 = arith.extui %0 : i1 to i32
    %c0_i32_0 = arith.constant 0 : i32
    %2 = arith.cmpi ne, %1, %c0_i32_0 : i32
    scf.if %2 {
      %cst_10 = arith.constant 0.000000e+00 : f32
      %12 = vector.broadcast %cst_10 : f32 to vector<200x256xf32>
      %c0_11 = arith.constant 0 : index
      %c0_12 = arith.constant 0 : index
      %13 = vector.load %arg7[%c0_11, %c0_12] : memref<200x256xf32, #tpu.memory_space<vmem>>, vector<200x256xf32>
      tpu.vector_store %arg7[%c0_11, %c0_12], %12 {strides = array<i32>} : memref<200x256xf32, #tpu.memory_space<vmem>>, vector<200x256xf32>,
    } else {
    }
    %c0 = arith.constant 0 : index
    %c0_1 = arith.constant 0 : index
    %3 = vector.load %arg3[%c0, %c0_1] : memref<200x384xf32, #tpu.memory_space<vmem>>, vector<200x384xf32>
    %c0_2 = arith.constant 0 : index
    %c0_3 = arith.constant 0 : index
    %4 = vector.load %arg7[%c0_2, %c0_3] : memref<200x256xf32, #tpu.memory_space<vmem>>, vector<200x256xf32>
    %c0_4 = arith.constant 0 : index
    %c0_5 = arith.constant 0 : index
    %5 = vector.load %arg4[%c0_4, %c0_5] : memref<384x256xf32, #tpu.memory_space<vmem>>, vector<384x256xf32>
    %cst = arith.constant dense<0.000000e+00> : vector<200x256xf32>
    %6 = tpu.matmul %3, %5, %cst {dimension_numbers = #tpu.dot_dimension_numbers<[1], [0], [0], [1], [0, 0, 1, 1], [], []>} : vector<200x384xf32>, vector<384x256xf32>, vector<200x256xf32> -> vector<200x256xf32>
    %7 = arith.addf %4, %6 : vector<200x256xf32>
    %c0_6 = arith.constant 0 : index
    %c0_7 = arith.constant 0 : index
    %8 = vector.load %arg7[%c0_6, %c0_7] : memref<200x256xf32, #tpu.memory_space<vmem>>, vector<200x256xf32>
    tpu.vector_store %arg7[%c0_6, %c0_7], %7 {strides = array<i32>} : memref<200x256xf32, #tpu.memory_space<vmem>>, vector<200x256xf32>,
    %c0_i32_8 = arith.constant 0 : i32
    %9 = arith.cmpi eq, %arg2, %c0_i32_8 : i32
    %10 = arith.extui %9 : i1 to i32
    %c0_i32_9 = arith.constant 0 : i32
    %11 = arith.cmpi ne, %10, %c0_i32_9 : i32
    scf.if %11 {
      %c0_10 = arith.constant 0 : index
      %c0_11 = arith.constant 0 : index
      %12 = vector.load %arg7[%c0_10, %c0_11] : memref<200x256xf32, #tpu.memory_space<vmem>>, vector<200x256xf32>
      %c0_12 = arith.constant 0 : index
      %c0_13 = arith.constant 0 : index
      %13 = vector.load %arg5[%c0_12, %c0_13] : memref<1x256xf32, #tpu.memory_space<vmem>>, vector<1x256xf32>
      %14 = vector.broadcast %13 : vector<1x256xf32> to vector<200x256xf32>
      %15 = arith.addf %12, %14 : vector<200x256xf32>
      %c0_14 = arith.constant 0 : index
      %c0_15 = arith.constant 0 : index
      %16 = vector.load %arg6[%c0_14, %c0_15] : memref<200x256xf32, #tpu.memory_space<vmem>>, vector<200x256xf32>
      tpu.vector_store %arg6[%c0_14, %c0_15], %15 {strides = array<i32>} : memref<200x256xf32, #tpu.memory_space<vmem>>, vector<200x256xf32>,
    } else {
    }
    return
  }
  func.func @transform_0(%arg0: i32, %arg1: i32, %arg2: i32) -> (i32, i32) {
    %c0_i32 = arith.constant 0 : i32
    return %arg0, %arg2 : i32, i32
  }
  func.func @transform_1(%arg0: i32, %arg1: i32, %arg2: i32) -> (i32, i32) {
    %c0_i32 = arith.constant 0 : i32
    return %arg2, %arg1 : i32, i32
  }
  func.func @transform_2(%arg0: i32, %arg1: i32, %arg2: i32) -> (i32, i32) {
    %c0_i32 = arith.constant 0 : i32
    %c0_i32_0 = arith.constant 0 : i32
    return %c0_i32, %arg1 : i32, i32
  }
  func.func @transform_3(%arg0: i32, %arg1: i32, %arg2: i32) -> (i32, i32) {
    %c0_i32 = arith.constant 0 : i32
    return %arg0, %arg1 : i32, i32
  }
}

</mosaic_0001>

<bundles_post_ra>
// kernel: tpu_custom_call.1
= control target key start
LH: loop header
LB: loop body
LE: loop exit
PB: predicated region body
PF: predicated region fallthrough
CT: control target
= control target key end

     0   :  { %8 = vsyncpa [#allocation4], 0  ;;  %s1722_s0 = inlined_call_operand.hbm [shape: f32[200,384], index: 0, kind: input, shape index: {}]   ;;  %s1723_s1 = inlined_call_operand.hbm [shape: f32[384,256], index: 1, kind: input, shape index: {}]   ;;  %s1724_s2 = inlined_call_operand.hbm [shape: f32[1,256], index: 2, kind: input, shape index: {}]   ;;  %s1725_s3 = inlined_call_operand.hbm [shape: f32[200,256], index: 3, kind: output, shape index: {}]  }
   0x1   :  { %9 = vsyncpa [#allocation7], 0  ;;  %s28_s14 = sshll.u32 %s1723_s1, 4  ;;  %s29_s14 = int_to_ptr.hbm [resolvable:$true] %s28_s14 }
   0x2   :  { %10 = vsyncpa [#allocation5], 0  ;;  %s1308_s15 = smov [#allocation6]   ;;  %s15_s19 = sshll.u32 %s1722_s0, 4  ;;  %s16_s19 = int_to_ptr.hbm [resolvable:$true] %s15_s19 }
   0x3   :  { %s30_s16 = sshll.u32 %s1308_s15, 4  ;;  %s1309_s20 = smov 256   ;;  %s31_s16 = int_to_ptr.vmem [resolvable:$true] %s30_s16 }
   0x4   :  { %s1310_s21 = smov 16   ;;  %s1311_s22 = smov [#allocation3]  }
   0x5   :  { %36 = dma.hbm_to_vmem [thread:$0]  %s29_s14, 12288, %s31_s16, [#allocation7], %s1309_s20, %s1309_s20, %s1310_s21  }
   0x6   :  { %s17_s23 = sshll.u32 %s1311_s22, 4  ;;  %s1312_s1 = smov 384   ;;  %s18_s23 = int_to_ptr.vmem [resolvable:$true] %s17_s23 }
   0x7   :  { %s1313_s24 = smov 24   ;;  %s42_s27 = sshll.u32 %s1724_s2, 4  ;;  %s43_s27 = int_to_ptr.hbm [resolvable:$true] %s42_s27 }
   0x8   :  { %23 = dma.hbm_to_vmem [thread:$0]  %s16_s19, 9600, %s18_s23, [#allocation4], %s1312_s1, %s1312_s1, %s1313_s24  }
   0x9   :  { %s1314_s28 = smov [#allocation8]  }
   0xa   :  { %s44_s0 = sshll.u32 %s1314_s28, 4  ;;  %s45_s0 = int_to_ptr.vmem [resolvable:$true] %s44_s0 }
   0xb   :  { %47 = dma.hbm_to_vmem [thread:$0]  %s43_s27, 32, %s45_s0, [#allocation7]  }
   0xc   :  { %1302 = dma.done.wait [#allocation4], 9600  }
   0xd   :  { %1303 = vsyncadd [#allocation4], 4294957696 }
   0xe   :  { %1304 = dma.done.wait [#allocation7], 12320  }
   0xf   :  { %1305 = vsyncadd [#allocation7], 4294954976  ;;  %v269_v0 = vld [vmem:[#allocation6 + $0xf0] sm:$0xff]  ;;  %v267_v2 = vld [vmem:[#allocation6 + $0xe0] sm:$0xff]  ;;  %s1315_s2 = smov [#allocation9]   ;;  %s1152_s5 = sshll.u32 %s1725_s3, 4  ;;  %s1153_s5 = int_to_ptr.hbm [resolvable:$true] %s1152_s5 }
  0x10   :  { %v301_v1 = vld [vmem:[#allocation6 + $0x1f0] sm:$0xff]  ;;  %335 = vmatpush.msra.mxu0 %v269_v0  ;;  %1166 = vmatpush.msra.mxu2 %v269_v0  ;;  %v299_v3 = vld [vmem:[#allocation6 + $0x1e0] sm:$0xff]  ;;  %v1348_v32 = vld [vmem:[#allocation3] sm:$0xff]  ;;  %s1150_s29 = sshll.u32 %s1315_s2, 4  ;;  %s1151_s29 = int_to_ptr.vmem [resolvable:$true] %s1150_s29 }
  0x11   :  { %427 = vmatpush.msra.mxu1 %v301_v1  ;;  %1182 = vmatpush.msra.mxu3 %v301_v1  ;;  %v265_v4 = vld [vmem:[#allocation6 + $0xd0] sm:$0xff]  ;;  %v263_v6 = vld [vmem:[#allocation6 + $0xc0] sm:$0xff]  ;;  %v302_v35 = vld [vmem:[#allocation6 + $0x1f8] sm:$0xff] }
  0x12   :  { %336 = vmatpush.msra.mxu0 %v267_v2  ;;  %1167 = vmatpush.msra.mxu2 %v267_v2  ;;  %v297_v5 = vld [vmem:[#allocation6 + $0x1d0] sm:$0xff]  ;;  %v295_v7 = vld [vmem:[#allocation6 + $0x1c0] sm:$0xff]  ;;  %v1355_v36 = vld [vmem:[#allocation3 + $0x140] sm:$0xff] }
  0x13   :  { %428 = vmatpush.msra.mxu1 %v299_v3  ;;  %1183 = vmatpush.msra.mxu3 %v299_v3  ;;  %v261_v8 = vld [vmem:[#allocation6 + $0xb0] sm:$0xff]  ;;  %v259_v10 = vld [vmem:[#allocation6 + $0xa0] sm:$0xff]  ;;  %v334_v37 = vld [vmem:[#allocation6 + $0x2f8] sm:$0xff] }
  0x14   :  { %337 = vmatpush.msra.mxu0 %v265_v4  ;;  %1168 = vmatpush.msra.mxu2 %v265_v4  ;;  %v293_v9 = vld [vmem:[#allocation6 + $0x1b0] sm:$0xff]  ;;  %v291_v11 = vld [vmem:[#allocation6 + $0x1a0] sm:$0xff]  ;;  %v270_v38 = vld [vmem:[#allocation6 + $0xf8] sm:$0xff] }
  0x15   :  { %429 = vmatpush.msra.mxu1 %v297_v5  ;;  %1184 = vmatpush.msra.mxu3 %v297_v5  ;;  %v257_v12 = vld [vmem:[#allocation6 + $0x90] sm:$0xff]  ;;  %v255_v14 = vld [vmem:[#allocation6 + $0x80] sm:$0xff]  ;;  %v300_v40 = vld [vmem:[#allocation6 + $0x1e8] sm:$0xff] }
  0x16   :  { %338 = vmatpush.msra.mxu0 %v263_v6  ;;  %1169 = vmatpush.msra.mxu2 %v263_v6  ;;  %v289_v13 = vld [vmem:[#allocation6 + $0x190] sm:$0xff]  ;;  %v287_v15 = vld [vmem:[#allocation6 + $0x180] sm:$0xff]  ;;  %v332_v41 = vld [vmem:[#allocation6 + $0x2e8] sm:$0xff] }
  0x17   :  { %430 = vmatpush.msra.mxu1 %v295_v7  ;;  %1185 = vmatpush.msra.mxu3 %v295_v7  ;;  %v253_v16 = vld [vmem:[#allocation6 + $0x70] sm:$0xff]  ;;  %v251_v18 = vld [vmem:[#allocation6 + $0x60] sm:$0xff]  ;;  %v268_v42 = vld [vmem:[#allocation6 + $0xe8] sm:$0xff] }
  0x18   :  { %339 = vmatpush.msra.mxu0 %v261_v8  ;;  %1170 = vmatpush.msra.mxu2 %v261_v8  ;;  %v285_v17 = vld [vmem:[#allocation6 + $0x170] sm:$0xff]  ;;  %v283_v19 = vld [vmem:[#allocation6 + $0x160] sm:$0xff]  ;;  %v298_v44 = vld [vmem:[#allocation6 + $0x1d8] sm:$0xff] }
  0x19   :  { %431 = vmatpush.msra.mxu1 %v293_v9  ;;  %1186 = vmatpush.msra.mxu3 %v293_v9  ;;  %v249_v20 = vld [vmem:[#allocation6 + $0x50] sm:$0xff]  ;;  %v247_v22 = vld [vmem:[#allocation6 + $0x40] sm:$0xff]  ;;  %v330_v45 = vld [vmem:[#allocation6 + $0x2d8] sm:$0xff] }
  0x1a   :  { %340 = vmatpush.msra.mxu0 %v259_v10  ;;  %1171 = vmatpush.msra.mxu2 %v259_v10  ;;  %v281_v21 = vld [vmem:[#allocation6 + $0x150] sm:$0xff]  ;;  %v279_v23 = vld [vmem:[#allocation6 + $0x140] sm:$0xff]  ;;  %v266_v47 = vld [vmem:[#allocation6 + $0xd8] sm:$0xff] }
  0x1b   :  { %432 = vmatpush.msra.mxu1 %v291_v11  ;;  %1187 = vmatpush.msra.mxu3 %v291_v11  ;;  %v245_v24 = vld [vmem:[#allocation6 + $0x30] sm:$0xff]  ;;  %v243_v26 = vld [vmem:[#allocation6 + $0x20] sm:$0xff]  ;;  %v1362_v48 = vld [vmem:[#allocation3 + $0x150] sm:$0xff] }
  0x1c   :  { %341 = vmatpush.msra.mxu0 %v257_v12  ;;  %1172 = vmatpush.msra.mxu2 %v257_v12  ;;  %v277_v25 = vld [vmem:[#allocation6 + $0x130] sm:$0xff]  ;;  %v275_v27 = vld [vmem:[#allocation6 + $0x120] sm:$0xff]  ;;  %v1364_v49 = vld [vmem:[#allocation3 + $0x20] sm:$0xff] }
  0x1d   :  { %433 = vmatpush.msra.mxu1 %v289_v13  ;;  %1188 = vmatpush.msra.mxu3 %v289_v13  ;;  %v241_v28 = vld [vmem:[#allocation6 + $0x10] sm:$0xff]  ;;  %v239_v30 = vld [vmem:[#allocation6] sm:$0xff]  ;;  %v264_v51 = vld [vmem:[#allocation6 + $0xc8] sm:$0xff] }
  0x1e   :  { %342 = vmatpush.msra.mxu0 %v255_v14  ;;  %1173 = vmatpush.msra.mxu2 %v255_v14  ;;  %v273_v29 = vld [vmem:[#allocation6 + $0x110] sm:$0xff]  ;;  %v271_v31 = vld [vmem:[#allocation6 + $0x100] sm:$0xff]  ;;  %v296_v53 = vld [vmem:[#allocation6 + $0x1c8] sm:$0xff] }
  0x1f   :  { %434 = vmatpush.msra.mxu1 %v287_v15  ;;  %1189 = vmatpush.msra.mxu3 %v287_v15  ;;  %v1350_v33 = vld [vmem:[#allocation3 + $0x138] sm:$0xff]  ;;  %v1352_v34 = vld [vmem:[#allocation3 + $0x8] sm:$0xff]  ;;  %v328_v55 = vld [vmem:[#allocation6 + $0x2c8] sm:$0xff] }
  0x20   :  { %343 = vmatpush.msra.mxu0 %v253_v16  ;;  %1174 = vmatpush.msra.mxu2 %v253_v16  ;;  %v333_v39 = vld [vmem:[#allocation6 + $0x2f0] sm:$0xff]  ;;  %v331_v43 = vld [vmem:[#allocation6 + $0x2e0] sm:$0xff]  ;;  %v262_v56 = vld [vmem:[#allocation6 + $0xb8] sm:$0xff] }
  0x21   :  { %435 = vmatpush.msra.mxu1 %v285_v17  ;;  %1190 = vmatpush.msra.mxu3 %v285_v17  ;;  %v1360_v46 = vld [vmem:[#allocation3 + $0x18] sm:$0xff]  ;;  %v329_v50 = vld [vmem:[#allocation6 + $0x2d0] sm:$0xff]  ;;  %v294_v57 = vld [vmem:[#allocation6 + $0x1b8] sm:$0xff] }
  0x22   :  { %344 = vmatpush.msra.mxu0 %v251_v18  ;;  %1175 = vmatpush.msra.mxu2 %v251_v18  ;;  %v1367_v52 = vld [vmem:[#allocation3 + $0x158] sm:$0xff]  ;;  %v325_v58 = vld [vmem:[#allocation6 + $0x2b0] sm:$0xff]  ;;  %v326_v59 = vld [vmem:[#allocation6 + $0x2b8] sm:$0xff] }
  0x23   :  { %436 = vmatpush.msra.mxu1 %v283_v19  ;;  %1191 = vmatpush.msra.mxu3 %v283_v19  ;;  %v327_v54 = vld [vmem:[#allocation6 + $0x2c0] sm:$0xff]  ;;  %v260_v60 = vld [vmem:[#allocation6 + $0xa8] sm:$0xff]  ;;  %v1372_v62 = vld [vmem:[#allocation3 + $0x30] sm:$0xff] }
  0x24   :  { %345 = vmatpush.msra.mxu0 %v249_v20  ;;  %1176 = vmatpush.msra.mxu2 %v249_v20  ;;  %v292_v61 = vld [vmem:[#allocation6 + $0x1a8] sm:$0xff]  ;;  %v323_v63 = vld [vmem:[#allocation6 + $0x2a0] sm:$0xff]  ;;  %v1374_v0 = vld [vmem:[#allocation3 + $0x168] sm:$0xff] }
  0x25   :  { %437 = vmatpush.msra.mxu1 %v281_v21  ;;  %1192 = vmatpush.msra.mxu3 %v281_v21  ;;  %v1376_v1 = vld [vmem:[#allocation3 + $0x38] sm:$0xff]  ;;  %v324_v2 = vld [vmem:[#allocation6 + $0x2a8] sm:$0xff]  ;;  %v258_v3 = vld [vmem:[#allocation6 + $0x98] sm:$0xff] }
  0x26   :  { %346 = vmatpush.msra.mxu0 %v247_v22  ;;  %1177 = vmatpush.msra.mxu2 %v247_v22  ;;  %v1379_v4 = vld [vmem:[#allocation3 + $0x170] sm:$0xff]  ;;  %v321_v6 = vld [vmem:[#allocation6 + $0x290] sm:$0xff]  ;;  %v256_v8 = vld [vmem:[#allocation6 + $0x88] sm:$0xff] }
  0x27   :  { %438 = vmatpush.msra.mxu1 %v279_v23  ;;  %1193 = vmatpush.msra.mxu3 %v279_v23  ;;  %v290_v5 = vld [vmem:[#allocation6 + $0x198] sm:$0xff]  ;;  %v288_v9 = vld [vmem:[#allocation6 + $0x188] sm:$0xff]  ;;  %v319_v10 = vld [vmem:[#allocation6 + $0x280] sm:$0xff] }
  0x28   :  { %347 = vmatpush.msra.mxu0 %v245_v24  ;;  %1178 = vmatpush.msra.mxu2 %v245_v24  ;;  %v322_v7 = vld [vmem:[#allocation6 + $0x298] sm:$0xff]  ;;  %v320_v11 = vld [vmem:[#allocation6 + $0x288] sm:$0xff]  ;;  %v1384_v14 = vld [vmem:[#allocation3 + $0x48] sm:$0xff] }
  0x29   :  { %439 = vmatpush.msra.mxu1 %v277_v25  ;;  %1194 = vmatpush.msra.mxu3 %v277_v25  ;;  %v254_v12 = vld [vmem:[#allocation6 + $0x78] sm:$0xff]  ;;  %v317_v15 = vld [vmem:[#allocation6 + $0x270] sm:$0xff]  ;;  %v1386_v16 = vld [vmem:[#allocation3 + $0x180] sm:$0xff] }
  0x2a   :  { %348 = vmatpush.msra.mxu0 %v243_v26  ;;  %1179 = vmatpush.msra.mxu2 %v243_v26  ;;  %v286_v13 = vld [vmem:[#allocation6 + $0x178] sm:$0xff]  ;;  %v1391_v19 = vld [vmem:[#allocation3 + $0x188] sm:$0xff]  ;;  %v252_v20 = vld [vmem:[#allocation6 + $0x68] sm:$0xff] }
  0x2b   :  { %440 = vmatpush.msra.mxu1 %v275_v27  ;;  %1195 = vmatpush.msra.mxu3 %v275_v27  ;;  %v1388_v17 = vld [vmem:[#allocation3 + $0x50] sm:$0xff]  ;;  %v315_v21 = vld [vmem:[#allocation6 + $0x260] sm:$0xff]  ;;  %v284_v22 = vld [vmem:[#allocation6 + $0x168] sm:$0xff] }
  0x2c   :  { %349 = vmatpush.msra.mxu0 %v241_v28  ;;  %1180 = vmatpush.msra.mxu2 %v241_v28  ;;  %v318_v18 = vld [vmem:[#allocation6 + $0x278] sm:$0xff]  ;;  %v316_v23 = vld [vmem:[#allocation6 + $0x268] sm:$0xff]  ;;  %v1398_v26 = vld [vmem:[#allocation3 + $0x198] sm:$0xff] }
  0x2d   :  { %441 = vmatpush.msra.mxu1 %v273_v29  ;;  %1196 = vmatpush.msra.mxu3 %v273_v29  ;;  %v250_v24 = vld [vmem:[#allocation6 + $0x58] sm:$0xff]  ;;  %v1396_v25 = vld [vmem:[#allocation3 + $0x60] sm:$0xff]  ;;  %v1400_v27 = vld [vmem:[#allocation3 + $0x68] sm:$0xff] }
  0x2e   :  { %350 = vmatpush.msra.mxu0 %v239_v30  ;;  %1181 = vmatpush.msra.mxu2 %v239_v30  ;;  %v1403_v28 = vld [vmem:[#allocation3 + $0x1a0] sm:$0xff]  ;;  %v313_v29 = vld [vmem:[#allocation6 + $0x250] sm:$0xff]  ;;  %v282_v30 = vld [vmem:[#allocation6 + $0x158] sm:$0xff] }
  0x2f   :  { %442 = vmatpush.msra.mxu1 %v271_v31  ;;  %351 = vmatmul.f32.vlgmr.msra.gmra.mxu0 %v1348_v32 }
  0x30   :  { %390 = vmatmul.f32.vlgmr.msra.gmra.mxu2 %v1350_v33  ;;  %443 = vmatmul.f32.vlgmr.msra.gmra.mxu1 %v1352_v34 }
  0x31   :  { %703 = vmatpush.msrb.mxu0 %v302_v35  ;;  %1197 = vmatpush.msra.mxu3 %v271_v31  ;;  %v314_v31 = vld [vmem:[#allocation6 + $0x258] sm:$0xff]  ;;  %v248_v35 = vld [vmem:[#allocation6 + $0x48] sm:$0xff] }
  0x32   :  { %482 = vmatmul.f32.vlgmr.msra.gmra.mxu3 %v1355_v36  ;;  %795 = vmatpush.msrb.mxu1 %v334_v37  ;;  %v311_v37 = vld [vmem:[#allocation6 + $0x240] sm:$0xff] }
  0x33   :  { %611 = vmatpush.msrb.mxu3 %v270_v38  ;;  %519 = vmatpush.msrb.mxu2 %v333_v39  ;;  %v1408_v38 = vld [vmem:[#allocation3 + $0x78] sm:$0xff]  ;;  %v1410_v39 = vld [vmem:[#allocation3 + $0x1b0] sm:$0xff] }
  0x34   :  { %704 = vmatpush.msrb.mxu0 %v300_v40  ;;  %796 = vmatpush.msrb.mxu1 %v332_v41  ;;  %v1412_v40 = vld [vmem:[#allocation3 + $0x80] sm:$0xff]  ;;  %v1415_v41 = vld [vmem:[#allocation3 + $0x1b8] sm:$0xff] }
  0x35   :  { %612 = vmatpush.msrb.mxu3 %v268_v42  ;;  %520 = vmatpush.msrb.mxu2 %v331_v43  ;;  %v280_v42 = vld [vmem:[#allocation6 + $0x148] sm:$0xff]  ;;  %v246_v43 = vld [vmem:[#allocation6 + $0x38] sm:$0xff] }
  0x36   :  { %705 = vmatpush.msrb.mxu0 %v298_v44  ;;  %797 = vmatpush.msrb.mxu1 %v330_v45  ;;  %v312_v44 = vld [vmem:[#allocation6 + $0x248] sm:$0xff]  ;;  %v309_v45 = vld [vmem:[#allocation6 + $0x230] sm:$0xff] }
  0x37   :  { %354 = vmatmul.f32.gmra.mxu0 %v1360_v46  ;;  %613 = vmatpush.msrb.mxu3 %v266_v47  ;;  %v278_v47 = vld [vmem:[#allocation6 + $0x138] sm:$0xff] }
  0x38   :  { %393 = vmatmul.f32.gmra.mxu2 %v1362_v48  ;;  %446 = vmatmul.f32.gmra.mxu1 %v1364_v49 }
  0x39   :  { %521 = vmatpush.msrb.mxu2 %v329_v50  ;;  %614 = vmatpush.msrb.mxu3 %v264_v51  ;;  %v1420_v50 = vld [vmem:[#allocation3 + $0x90] sm:$0xff]  ;;  %v1422_v51 = vld [vmem:[#allocation3 + $0x1c8] sm:$0xff] }
  0x3a   :  { %485 = vmatmul.f32.gmra.mxu3 %v1367_v52  ;;  %706 = vmatpush.msrb.mxu0 %v296_v53  ;;  %v1424_v53 = vld [vmem:[#allocation3 + $0x98] sm:$0xff] }
  0x3b   :  { %522 = vmatpush.msrb.mxu2 %v327_v54  ;;  %798 = vmatpush.msrb.mxu1 %v328_v55  ;;  %v1427_v54 = vld [vmem:[#allocation3 + $0x1d0] sm:$0xff]  ;;  %v244_v55 = vld [vmem:[#allocation6 + $0x28] sm:$0xff] }
  0x3c   :  { %615 = vmatpush.msrb.mxu3 %v262_v56  ;;  %707 = vmatpush.msrb.mxu0 %v294_v57  ;;  %v310_v56 = vld [vmem:[#allocation6 + $0x238] sm:$0xff]  ;;  %v307_v57 = vld [vmem:[#allocation6 + $0x220] sm:$0xff] }
  0x3d   :  { %523 = vmatpush.msrb.mxu2 %v325_v58  ;;  %799 = vmatpush.msrb.mxu1 %v326_v59  ;;  %v276_v58 = vld [vmem:[#allocation6 + $0x128] sm:$0xff]  ;;  %v242_v59 = vld [vmem:[#allocation6 + $0x18] sm:$0xff] }
  0x3e   :  { %616 = vmatpush.msrb.mxu3 %v260_v60  ;;  %708 = vmatpush.msrb.mxu0 %v292_v61  ;;  %v308_v60 = vld [vmem:[#allocation6 + $0x228] sm:$0xff]  ;;  %v1432_v61 = vld [vmem:[#allocation3 + $0xa8] sm:$0xff] }
  0x3f   :  { %357 = vmatmul.f32.gmra.mxu0 %v1372_v62  ;;  %524 = vmatpush.msrb.mxu2 %v323_v63  ;;  %v1434_v63 = vld [vmem:[#allocation3 + $0x1e0] sm:$0xff] }
  0x40   :  { %396 = vmatmul.f32.gmra.mxu2 %v1374_v0  ;;  %449 = vmatmul.f32.gmra.mxu1 %v1376_v1 }
  0x41   :  { %800 = vmatpush.msrb.mxu1 %v324_v2  ;;  %617 = vmatpush.msrb.mxu3 %v258_v3  ;;  %v1436_v2 = vld [vmem:[#allocation3 + $0xb0] sm:$0xff]  ;;  %v1439_v3 = vld [vmem:[#allocation3 + $0x1e8] sm:$0xff] }
  0x42   :  { %488 = vmatmul.f32.gmra.mxu3 %v1379_v4  ;;  %709 = vmatpush.msrb.mxu0 %v290_v5  ;;  %v305_v5 = vld [vmem:[#allocation6 + $0x210] sm:$0xff] }
  0x43   :  { %525 = vmatpush.msrb.mxu2 %v321_v6  ;;  %801 = vmatpush.msrb.mxu1 %v322_v7  ;;  %v274_v6 = vld [vmem:[#allocation6 + $0x118] sm:$0xff]  ;;  %v240_v7 = vld [vmem:[#allocation6 + $0x8] sm:$0xff] }
  0x44   :  { %618 = vmatpush.msrb.mxu3 %v256_v8  ;;  %710 = vmatpush.msrb.mxu0 %v288_v9  ;;  %v306_v8 = vld [vmem:[#allocation6 + $0x218] sm:$0xff]  ;;  %v303_v9 = vld [vmem:[#allocation6 + $0x200] sm:$0xff] }
  0x45   :  { %526 = vmatpush.msrb.mxu2 %v319_v10  ;;  %802 = vmatpush.msrb.mxu1 %v320_v11  ;;  %v1444_v10 = vld [vmem:[#allocation3 + $0xc0] sm:$0xff]  ;;  %v1446_v11 = vld [vmem:[#allocation3 + $0x1f8] sm:$0xff] }
  0x46   :  { %619 = vmatpush.msrb.mxu3 %v254_v12  ;;  %711 = vmatpush.msrb.mxu0 %v286_v13  ;;  %v1448_v12 = vld [vmem:[#allocation3 + $0xc8] sm:$0xff]  ;;  %v1451_v13 = vld [vmem:[#allocation3 + $0x200] sm:$0xff] }
  0x47   :  { %360 = vmatmul.f32.gmra.mxu0 %v1384_v14  ;;  %527 = vmatpush.msrb.mxu2 %v317_v15  ;;  %v272_v15 = vld [vmem:[#allocation6 + $0x108] sm:$0xff] }
  0x48   :  { %399 = vmatmul.f32.gmra.mxu2 %v1386_v16  ;;  %452 = vmatmul.f32.gmra.mxu1 %v1388_v17 }
  0x49   :  { %803 = vmatpush.msrb.mxu1 %v318_v18  ;;  %620 = vmatpush.msrb.mxu3 %v252_v20  ;;  %v304_v18 = vld [vmem:[#allocation6 + $0x208] sm:$0xff]  ;;  %v1456_v20 = vld [vmem:[#allocation3 + $0xd8] sm:$0xff] }
  0x4a   :  { %491 = vmatmul.f32.gmra.mxu3 %v1391_v19  ;;  %528 = vmatpush.msrb.mxu2 %v315_v21  ;;  %v1458_v21 = vld [vmem:[#allocation3 + $0x210] sm:$0xff] }
  0x4b   :  { %712 = vmatpush.msrb.mxu0 %v284_v22  ;;  %804 = vmatpush.msrb.mxu1 %v316_v23  ;;  %v1460_v22 = vld [vmem:[#allocation3 + $0xe0] sm:$0xff]  ;;  %v1463_v23 = vld [vmem:[#allocation3 + $0x218] sm:$0xff] }
  0x4c   :  { %621 = vmatpush.msrb.mxu3 %v250_v24  ;;  %529 = vmatpush.msrb.mxu2 %v313_v29  ;;  %v1468_v24 = vld [vmem:[#allocation3 + $0xf0] sm:$0xff]  ;;  %v1470_v29 = vld [vmem:[#allocation3 + $0x228] sm:$0xff] }
  0x4d   :  { %713 = vmatpush.msrb.mxu0 %v282_v30  ;;  %805 = vmatpush.msrb.mxu1 %v314_v31  ;;  %v1472_v30 = vld [vmem:[#allocation3 + $0xf8] sm:$0xff]  ;;  %v1475_v31 = vld [vmem:[#allocation3 + $0x230] sm:$0xff] }
  0x4e   :  { %622 = vmatpush.msrb.mxu3 %v248_v35  ;;  %530 = vmatpush.msrb.mxu2 %v311_v37  ;;  %v1480_v35 = vld [vmem:[#allocation3 + $0x108] sm:$0xff]  ;;  %v1482_v37 = vld [vmem:[#allocation3 + $0x240] sm:$0xff] }
  0x4f   :  { %363 = vmatmul.f32.gmra.mxu0 %v1396_v25  ;;  %806 = vmatpush.msrb.mxu1 %v312_v44  ;;  %v1492_v44 = vld [vmem:[#allocation3 + $0x120] sm:$0xff] }
  0x50   :  { %402 = vmatmul.f32.gmra.mxu2 %v1398_v26  ;;  %455 = vmatmul.f32.gmra.mxu1 %v1400_v27 }
  0x51   :  { %714 = vmatpush.msrb.mxu0 %v280_v42  ;;  %623 = vmatpush.msrb.mxu3 %v246_v43  ;;  %v1484_v42 = vld [vmem:[#allocation3 + $0x110] sm:$0xff]  ;;  %v1487_v43 = vld [vmem:[#allocation3 + $0x248] sm:$0xff] }
  0x52   :  { %494 = vmatmul.f32.gmra.mxu3 %v1403_v28  ;;  %531 = vmatpush.msrb.mxu2 %v309_v45  ;;  %v1494_v45 = vld [vmem:[#allocation3 + $0x128] sm:$0xff] }
  0x53   :  { %715 = vmatpush.msrb.mxu0 %v278_v47  ;;  %624 = vmatpush.msrb.mxu3 %v244_v55  ;;  %v116_v47 = vld [vmem:[#allocation3 + $0x10] sm:$0xff]  ;;  %v119_v55 = vld [vmem:[#allocation3 + $0x28] sm:$0xff] }
  0x54   :  { %807 = vmatpush.msrb.mxu1 %v310_v56  ;;  %532 = vmatpush.msrb.mxu2 %v307_v57  ;;  %v122_v56 = vld [vmem:[#allocation3 + $0x40] sm:$0xff]  ;;  %v125_v57 = vld [vmem:[#allocation3 + $0x58] sm:$0xff] }
  0x55   :  { %716 = vmatpush.msrb.mxu0 %v276_v58  ;;  %625 = vmatpush.msrb.mxu3 %v242_v59  ;;  %v128_v58 = vld [vmem:[#allocation3 + $0x70] sm:$0xff]  ;;  %v131_v59 = vld [vmem:[#allocation3 + $0x88] sm:$0xff] }
  0x56   :  { %808 = vmatpush.msrb.mxu1 %v308_v60  ;;  %533 = vmatpush.msrb.mxu2 %v305_v5 }
  0x57   :  { %366 = vmatmul.f32.gmra.mxu0 %v1408_v38  ;;  %626 = vmatpush.msrb.mxu3 %v240_v7 }
  0x58   :  { %405 = vmatmul.f32.gmra.mxu2 %v1410_v39  ;;  %458 = vmatmul.f32.gmra.mxu1 %v1412_v40 }
  0x59   :  { %717 = vmatpush.msrb.mxu0 %v274_v6  ;;  %809 = vmatpush.msrb.mxu1 %v306_v8  ;;  %v134_v6 = vld [vmem:[#allocation3 + $0xa0] sm:$0xff] }
  0x5a   :  { %497 = vmatmul.f32.gmra.mxu3 %v1415_v41  ;;  %534 = vmatpush.msrb.mxu2 %v303_v9 }
  0x5b   :  { %718 = vmatpush.msrb.mxu0 %v272_v15  ;;  %810 = vmatpush.msrb.mxu1 %v304_v18  ;;  %v137_v15 = vld [vmem:[#allocation3 + $0xb8] sm:$0xff] }
  0x5f   :  { %369 = vmatmul.f32.gmra.mxu0 %v1420_v50 }
  0x60   :  { %408 = vmatmul.f32.gmra.mxu2 %v1422_v51  ;;  %461 = vmatmul.f32.gmra.mxu1 %v1424_v53 }
  0x62   :  { %500 = vmatmul.f32.gmra.mxu3 %v1427_v54 }
  0x67   :  { %372 = vmatmul.f32.gmra.mxu0 %v1432_v61 }
  0x68   :  { %411 = vmatmul.f32.gmra.mxu2 %v1434_v63  ;;  %464 = vmatmul.f32.gmra.mxu1 %v1436_v2 }
  0x6a   :  { %503 = vmatmul.f32.gmra.mxu3 %v1439_v3 }
  0x6f   :  { %375 = vmatmul.f32.gmra.mxu0 %v1444_v10 }
  0x70   :  { %414 = vmatmul.f32.gmra.mxu2 %v1446_v11  ;;  %467 = vmatmul.f32.gmra.mxu1 %v1448_v12 }
  0x72   :  { %506 = vmatmul.f32.gmra.mxu3 %v1451_v13 }
  0x77   :  { %378 = vmatmul.f32.gmra.mxu0 %v1456_v20 }
  0x78   :  { %417 = vmatmul.f32.gmra.mxu2 %v1458_v21  ;;  %470 = vmatmul.f32.gmra.mxu1 %v1460_v22 }
  0x7a   :  { %509 = vmatmul.f32.gmra.mxu3 %v1463_v23 }
  0x7f   :  { %381 = vmatmul.f32.gmra.mxu0 %v1468_v24 }
  0x80   :  { %420 = vmatmul.f32.gmra.mxu2 %v1470_v29  ;;  %473 = vmatmul.f32.gmra.mxu1 %v1472_v30 }
  0x82   :  { %512 = vmatmul.f32.gmra.mxu3 %v1475_v31 }
  0x87   :  { %384 = vmatmul.f32.gmra.mxu0 %v1480_v35 }
  0x88   :  { %423 = vmatmul.f32.gmra.mxu2 %v1482_v37  ;;  %476 = vmatmul.f32.gmra.mxu1 %v1484_v42 }
  0x8a   :  { %515 = vmatmul.f32.gmra.mxu3 %v1487_v43 }
  0x8f   :  { %387 = vmatmul.f32.gmra.mxu0 %v1492_v44 }
  0x90   :  { %479 = vmatmul.f32.gmra.mxu1 %v1494_v45  ;;  %535 = vmatmul.f32.vlgmr.msrb.gmra.mxu2 %v116_v47 }
  0x92   :  { %627 = vmatmul.f32.vlgmr.msrb.gmra.mxu3 %v1348_v32 }
  0x97   :  { %719 = vmatmul.f32.vlgmr.msrb.gmra.mxu0 %v1352_v34 }
  0x98   :  { %538 = vmatmul.f32.gmra.mxu2 %v119_v55  ;;  %811 = vmatmul.f32.vlgmr.msrb.gmra.mxu1 %v116_v47 }
  0x9a   :  { %630 = vmatmul.f32.gmra.mxu3 %v1360_v46 }
  0x9f   :  { %722 = vmatmul.f32.gmra.mxu0 %v1364_v49 }
  0xa0   :  { %541 = vmatmul.f32.gmra.mxu2 %v122_v56  ;;  %814 = vmatmul.f32.gmra.mxu1 %v119_v55 }
  0xa2   :  { %633 = vmatmul.f32.gmra.mxu3 %v1372_v62 }
  0xa7   :  { %725 = vmatmul.f32.gmra.mxu0 %v1376_v1 }
  0xa8   :  { %544 = vmatmul.f32.gmra.mxu2 %v125_v57  ;;  %817 = vmatmul.f32.gmra.mxu1 %v122_v56  ;;  %v140_v56 = vld [vmem:[#allocation3 + $0xd0] sm:$0xff] }
  0xaa   :  { %636 = vmatmul.f32.gmra.mxu3 %v1384_v14 }
  0xac   :  { %v1505_v32 = vpop.f32.mrf.mxu0 }
  0xad   :  { %v1507_v34 = vpop.f32.mrf.mxu1 }
  0xaf   :  { %728 = vmatmul.f32.gmra.mxu0 %v1388_v17 }
  0xb0   :  { %547 = vmatmul.f32.gmra.mxu2 %v128_v58  ;;  %820 = vmatmul.f32.gmra.mxu1 %v125_v57 }
  0xb2   :  { %639 = vmatmul.f32.gmra.mxu3 %v1396_v25 }
  0xb3   :  { %v391_v46 = vpop.f32.mrf.mxu2 }
  0xb4   :  { %v1511_v49 = vpop.f32.mrf.mxu0 }
  0xb5   :  { %v1513_v62 = vpop.f32.mrf.mxu1  ;;  %v483_v1 = vpop.f32.mrf.mxu3 }
  0xb6   :  { %v1515_v60 = vadd.f32 %v483_v1, %v391_v46  ;;  %v143_v1 = vld [vmem:[#allocation3 + $0xe8] sm:$0xff] }
  0xb7   :  { %731 = vmatmul.f32.gmra.mxu0 %v1400_v27 }
  0xb8   :  { %550 = vmatmul.f32.gmra.mxu2 %v131_v59  ;;  %823 = vmatmul.f32.gmra.mxu1 %v128_v58 }
  0xba   :  { %642 = vmatmul.f32.gmra.mxu3 %v1408_v38 }
  0xbb   :  { %v394_v14 = vpop.f32.mrf.mxu2 }
  0xbc   :  { %v1519_v17 = vpop.f32.mrf.mxu0 }
  0xbd   :  { %v1521_v5 = vpop.f32.mrf.mxu1  ;;  %v486_v25 = vpop.f32.mrf.mxu3 }
  0xbe   :  { %v1523_v7 = vadd.f32 %v486_v25, %v394_v14 }
  0xbf   :  { %734 = vmatmul.f32.gmra.mxu0 %v1412_v40 }
  0xc0   :  { %553 = vmatmul.f32.gmra.mxu2 %v134_v6  ;;  %826 = vmatmul.f32.gmra.mxu1 %v131_v59 }
  0xc2   :  { %645 = vmatmul.f32.gmra.mxu3 %v1420_v50 }
  0xc3   :  { %v397_v27 = vpop.f32.mrf.mxu2 }
  0xc4   :  { %v1527_v8 = vpop.f32.mrf.mxu0 }
  0xc5   :  { %v1529_v9 = vpop.f32.mrf.mxu1  ;;  %v489_v38 = vpop.f32.mrf.mxu3 }
  0xc6   :  { %v1531_v18 = vadd.f32 %v489_v38, %v397_v27 }
  0xc7   :  { %737 = vmatmul.f32.gmra.mxu0 %v1424_v53 }
  0xc8   :  { %556 = vmatmul.f32.gmra.mxu2 %v137_v15  ;;  %829 = vmatmul.f32.gmra.mxu1 %v134_v6  ;;  %v146_v6 = vld [vmem:[#allocation3 + $0x100] sm:$0xff] }
  0xca   :  { %648 = vmatmul.f32.gmra.mxu3 %v1432_v61 }
  0xcb   :  { %v400_v40 = vpop.f32.mrf.mxu2 }
  0xcc   :  { %v1535_v47 = vpop.f32.mrf.mxu0 }
  0xcd   :  { %v1537_v55 = vpop.f32.mrf.mxu1  ;;  %v492_v50 = vpop.f32.mrf.mxu3 }
  0xce   :  { %v1539_v57 = vadd.f32 %v492_v50, %v400_v40  ;;  %v149_v40 = vld [vmem:[#allocation3 + $0x118] sm:$0xff] }
  0xcf   :  { %740 = vmatmul.f32.gmra.mxu0 %v1436_v2 }
  0xd0   :  { %559 = vmatmul.f32.gmra.mxu2 %v140_v56  ;;  %832 = vmatmul.f32.gmra.mxu1 %v137_v15 }
  0xd2   :  { %651 = vmatmul.f32.gmra.mxu3 %v1444_v10 }
  0xd3   :  { %v403_v53 = vpop.f32.mrf.mxu2 }
  0xd4   :  { %v1543_v58 = vpop.f32.mrf.mxu0 }
  0xd5   :  { %v1545_v46 = vpop.f32.mrf.mxu1  ;;  %v495_v61 = vpop.f32.mrf.mxu3 }
  0xd6   :  { %v1547_v59 = vadd.f32 %v495_v61, %v403_v53  ;;  %v152_v61 = vld [vmem:[#allocation3 + $0x130] sm:$0xff] }
  0xd7   :  { %743 = vmatmul.f32.gmra.mxu0 %v1448_v12 }
  0xd8   :  { %562 = vmatmul.f32.gmra.mxu2 %v143_v1  ;;  %835 = vmatmul.f32.gmra.mxu1 %v140_v56 }
  0xda   :  { %654 = vmatmul.f32.gmra.mxu3 %v1456_v20 }
  0xdb   :  { %v406_v2 = vpop.f32.mrf.mxu2 }
  0xdc   :  { %v1551_v14 = vpop.f32.mrf.mxu0 }
  0xdd   :  { %v1553_v25 = vpop.f32.mrf.mxu1  ;;  %v498_v10 = vpop.f32.mrf.mxu3 }
  0xde   :  { %v1555_v27 = vadd.f32 %v498_v10, %v406_v2 }
  0xdf   :  { %746 = vmatmul.f32.gmra.mxu0 %v1460_v22 }
  0xe0   :  { %1726 = vst [vmem:[#allocation13_spill] sm:$0xff] %v1555_v27  ;;  %565 = vmatmul.f32.gmra.mxu2 %v146_v6  ;;  %838 = vmatmul.f32.gmra.mxu1 %v143_v1  ;;  %v167_v27 = vld [vmem:[#allocation3 + $0x1a8] sm:$0xff] }
  0xe2   :  { %657 = vmatmul.f32.gmra.mxu3 %v1468_v24 }
  0xe3   :  { %v409_v12 = vpop.f32.mrf.mxu2 }
  0xe4   :  { %v1559_v38 = vpop.f32.mrf.mxu0 }
  0xe5   :  { %v1561_v15 = vpop.f32.mrf.mxu1  ;;  %v501_v20 = vpop.f32.mrf.mxu3 }
  0xe6   :  { %v1563_v50 = vadd.f32 %v501_v20, %v409_v12 }
  0xe7   :  { %749 = vmatmul.f32.gmra.mxu0 %v1472_v30 }
  0xe8   :  { %1727 = vst [vmem:[#allocation14_spill] sm:$0xff] %v1563_v50  ;;  %568 = vmatmul.f32.gmra.mxu2 %v149_v40  ;;  %841 = vmatmul.f32.gmra.mxu1 %v146_v6  ;;  %v155_v6 = vld [vmem:[#allocation3 + $0x148] sm:$0xff] }
  0xea   :  { %660 = vmatmul.f32.gmra.mxu3 %v1480_v35 }
  0xeb   :  { %v412_v22 = vpop.f32.mrf.mxu2 }
  0xec   :  { %v1567_v56 = vpop.f32.mrf.mxu0 }
  0xed   :  { %v1569_v53 = vpop.f32.mrf.mxu1  ;;  %v504_v24 = vpop.f32.mrf.mxu3 }
  0xee   :  { %v1571_v1 = vadd.f32 %v504_v24, %v412_v22  ;;  %v158_v22 = vld [vmem:[#allocation3 + $0x160] sm:$0xff] }
  0xef   :  { %752 = vmatmul.f32.gmra.mxu0 %v1484_v42 }
  0xf0   :  { %1728 = vst [vmem:[#allocation15_spill] sm:$0xff] %v1571_v1  ;;  %571 = vmatmul.f32.gmra.mxu2 %v152_v61  ;;  %844 = vmatmul.f32.gmra.mxu1 %v149_v40  ;;  %v1040_v1 = vld [vmem:[#allocation8] sm:$0x3] }
  0xf2   :  { %663 = vmatmul.f32.gmra.mxu3 %v1492_v44 }
  0xf3   :  { %v415_v30 = vpop.f32.mrf.mxu2 }
  0xf4   :  { %v1575_v2 = vpop.f32.mrf.mxu0 }
  0xf5   :  { %v1577_v10 = vpop.f32.mrf.mxu1  ;;  %v507_v35 = vpop.f32.mrf.mxu3 }
  0xf6   :  { %v1579_v12 = vadd.f32 %v507_v35, %v415_v30  ;;  %v161_v35 = vld [vmem:[#allocation3 + $0x178] sm:$0xff] }
  0xf7   :  { %755 = vmatmul.f32.gmra.mxu0 %v1494_v45 }
  0xf8   :  { %1729 = vst [vmem:[#allocation16_spill] sm:$0xff] %v1579_v12  ;;  %574 = vmatmul.f32.gmra.mxu2 %v155_v6  ;;  %847 = vmatmul.f32.gmra.mxu1 %v152_v61 }
  0xfa   :  { %666 = vmatmul.f32.gmra.mxu3 %v1350_v33 }
  0xfb   :  { %v418_v42 = vpop.f32.mrf.mxu2 }
  0xfc   :  { %v1583_v20 = vpop.f32.mrf.mxu0 }
  0xfd   :  { %v1585_v40 = vpop.f32.mrf.mxu1  ;;  %v510_v44 = vpop.f32.mrf.mxu3 }
  0xfe   :  { %v1587_v24 = vadd.f32 %v510_v44, %v418_v42  ;;  %v164_v44 = vld [vmem:[#allocation3 + $0x190] sm:$0xff] }
  0xff   :  { %758 = vmatmul.f32.gmra.mxu0 %v1355_v36 }
 0x100   :  { %1730 = vst [vmem:[#allocation17_spill] sm:$0xff] %v1587_v24  ;;  %577 = vmatmul.f32.gmra.mxu2 %v158_v22  ;;  %850 = vmatmul.f32.gmra.mxu1 %v155_v6 }
 0x102   :  { %669 = vmatmul.f32.gmra.mxu3 %v1362_v48 }
 0x103   :  { %v421_v45 = vpop.f32.mrf.mxu2 }
 0x104   :  { %v1591_v30 = vpop.f32.mrf.mxu0 }
 0x105   :  { %v1593_v61 = vpop.f32.mrf.mxu1  ;;  %v513_v33 = vpop.f32.mrf.mxu3 }
 0x106   :  { %v1595_v12 = vadd.f32 %v513_v33, %v421_v45 }
 0x107   :  { %761 = vmatmul.f32.gmra.mxu0 %v1367_v52  ;;  %v445_v52 = vadd.f32 %v1507_v34, %v1505_v32 }
 0x108   :  { %1731 = vst [vmem:[#allocation18_spill] sm:$0xff] %v1595_v12  ;;  %580 = vmatmul.f32.gmra.mxu2 %v161_v35  ;;  %853 = vmatmul.f32.gmra.mxu1 %v158_v22 }
 0x10a   :  { %672 = vmatmul.f32.gmra.mxu3 %v1374_v0  ;;  %v1609_v0 = vperm.slane %v1040_v1, 0 }
 0x10b   :  { %v424_v36 = vpop.f32.mrf.mxu2 }
 0x10c   :  { %v1599_v42 = vpop.f32.mrf.mxu0 }
 0x10d   :  { %v1601_v6 = vpop.f32.mrf.mxu1  ;;  %v516_v48 = vpop.f32.mrf.mxu3 }
 0x10e   :  { %v1603_v24 = vadd.f32 %v516_v48, %v424_v36 }
 0x10f   :  { %764 = vmatmul.f32.gmra.mxu0 %v1379_v4  ;;  %v1612_v4 = vperm.slane %v1040_v1, 1 }
 0x110   :  { %583 = vmatmul.f32.gmra.mxu2 %v164_v44  ;;  %856 = vmatmul.f32.gmra.mxu1 %v161_v35 }
 0x112   :  { %675 = vmatmul.f32.gmra.mxu3 %v1386_v16  ;;  %v448_v16 = vadd.f32 %v1513_v62, %v1511_v49  ;;  %v451_v49 = vadd.f32 %v1521_v5, %v1519_v17  ;;  %v454_v17 = vadd.f32 %v1529_v9, %v1527_v8  ;;  %v457_v8 = vadd.f32 %v1537_v55, %v1535_v47 }
 0x113   :  { %v536_v22 = vpop.f32.mrf.mxu2  ;;  %v460_v47 = vadd.f32 %v1545_v46, %v1543_v58  ;;  %v463_v58 = vadd.f32 %v1553_v25, %v1551_v14  ;;  %v466_v14 = vadd.f32 %v1561_v15, %v1559_v38  ;;  %v469_v38 = vadd.f32 %v1569_v53, %v1567_v56 }
 0x114   :  { %v537_v45 = vadd.f32 %v536_v22, %v445_v52  ;;  %v720_v33 = vpop.f32.mrf.mxu0  ;;  %v472_v56 = vadd.f32 %v1577_v10, %v1575_v2 }
 0x115   :  { %v628_v12 = vpop.f32.mrf.mxu3  ;;  %v812_v50 = vpop.f32.mrf.mxu1 }
 0x116   :  { %v1046_v36 = vadd.f32 %v1609_v0, %v537_v45  ;;  %v721_v48 = vadd.f32 %v720_v33, %v628_v12  ;;  %v170_v45 = vld [vmem:[#allocation3 + $0x1c0] sm:$0xff] }
 0x117   :  { %767 = vmatmul.f32.gmra.mxu0 %v1391_v19 }
 0x118   :  { %1096 = vst [vmem:[#allocation9] sm:$0xff] %v1046_v36  ;;  %v813_v35 = vadd.f32 %v812_v50, %v721_v48  ;;  %586 = vmatmul.f32.gmra.mxu2 %v167_v27  ;;  %859 = vmatmul.f32.gmra.mxu1 %v164_v44 }
 0x11a   :  { %v1047_v32 = vadd.f32 %v1612_v4, %v813_v35  ;;  %678 = vmatmul.f32.gmra.mxu3 %v1398_v26 }
 0x11b   :  { %v539_v34 = vpop.f32.mrf.mxu2 }
 0x11c   :  { %1097 = vst [vmem:[#allocation9 + $0x8] sm:$0xff] %v1047_v32  ;;  %v540_v52 = vadd.f32 %v539_v34, %v448_v16  ;;  %v723_v22 = vpop.f32.mrf.mxu0  ;;  %v173_v16 = vld [vmem:[#allocation3 + $0x1d8] sm:$0xff] }
 0x11d   :  { %v631_v12 = vpop.f32.mrf.mxu3  ;;  %v815_v1 = vpop.f32.mrf.mxu1 }
 0x11e   :  { %v1048_v19 = vadd.f32 %v1609_v0, %v540_v52  ;;  %v724_v33 = vadd.f32 %v723_v22, %v631_v12 }
 0x11f   :  { %770 = vmatmul.f32.gmra.mxu0 %v1403_v28 }
 0x120   :  { %1098 = vst [vmem:[#allocation9 + $0x10] sm:$0xff] %v1048_v19  ;;  %v816_v50 = vadd.f32 %v815_v1, %v724_v33  ;;  %589 = vmatmul.f32.gmra.mxu2 %v170_v45  ;;  %862 = vmatmul.f32.gmra.mxu1 %v167_v27  ;;  %v176_v1 = vld [vmem:[#allocation3 + $0x1f0] sm:$0xff] }
 0x122   :  { %v1049_v26 = vadd.f32 %v1612_v4, %v816_v50  ;;  %681 = vmatmul.f32.gmra.mxu3 %v1410_v39 }
 0x123   :  { %v542_v62 = vpop.f32.mrf.mxu2 }
 0x124   :  { %1099 = vst [vmem:[#allocation9 + $0x18] sm:$0xff] %v1049_v26  ;;  %v543_v44 = vadd.f32 %v542_v62, %v451_v49  ;;  %v726_v36 = vpop.f32.mrf.mxu0  ;;  %v179_v62 = vld [vmem:[#allocation3 + $0x208] sm:$0xff] }
 0x125   :  { %v634_v48 = vpop.f32.mrf.mxu3  ;;  %v818_v35 = vpop.f32.mrf.mxu1 }
 0x126   :  { %v1050_v28 = vadd.f32 %v1609_v0, %v543_v44  ;;  %v727_v32 = vadd.f32 %v726_v36, %v634_v48 }
 0x127   :  { %773 = vmatmul.f32.gmra.mxu0 %v1415_v41 }
 0x128   :  { %1100 = vst [vmem:[#allocation9 + $0x20] sm:$0xff] %v1050_v28  ;;  %v819_v27 = vadd.f32 %v818_v35, %v727_v32  ;;  %592 = vmatmul.f32.gmra.mxu2 %v173_v16  ;;  %865 = vmatmul.f32.gmra.mxu1 %v170_v45  ;;  %v182_v32 = vld [vmem:[#allocation3 + $0x220] sm:$0xff] }
 0x12a   :  { %v1051_v39 = vadd.f32 %v1612_v4, %v819_v27  ;;  %684 = vmatmul.f32.gmra.mxu3 %v1422_v51 }
 0x12b   :  { %v545_v5 = vpop.f32.mrf.mxu2 }
 0x12c   :  { %1101 = vst [vmem:[#allocation9 + $0x28] sm:$0xff] %v1051_v39  ;;  %v546_v34 = vadd.f32 %v545_v5, %v454_v17  ;;  %v729_v52 = vpop.f32.mrf.mxu0 }
 0x12d   :  { %v637_v22 = vpop.f32.mrf.mxu3  ;;  %v821_v12 = vpop.f32.mrf.mxu1 }
 0x12e   :  { %v1052_v41 = vadd.f32 %v1609_v0, %v546_v34  ;;  %v730_v19 = vadd.f32 %v729_v52, %v637_v22  ;;  %v185_v22 = vld [vmem:[#allocation3 + $0x238] sm:$0xff] }
 0x12f   :  { %776 = vmatmul.f32.gmra.mxu0 %v1427_v54 }
 0x130   :  { %1102 = vst [vmem:[#allocation9 + $0x30] sm:$0xff] %v1052_v41  ;;  %v822_v45 = vadd.f32 %v821_v12, %v730_v19  ;;  %595 = vmatmul.f32.gmra.mxu2 %v176_v1  ;;  %868 = vmatmul.f32.gmra.mxu1 %v173_v16 }
 0x132   :  { %v1053_v51 = vadd.f32 %v1612_v4, %v822_v45  ;;  %687 = vmatmul.f32.gmra.mxu3 %v1434_v63 }
 0x133   :  { %v548_v9 = vpop.f32.mrf.mxu2 }
 0x134   :  { %1103 = vst [vmem:[#allocation9 + $0x38] sm:$0xff] %v1053_v51  ;;  %v549_v33 = vadd.f32 %v548_v9, %v457_v8  ;;  %v732_v50 = vpop.f32.mrf.mxu0  ;;  %v188_v51 = vld [vmem:[#allocation3 + $0x250] sm:$0xff] }
 0x135   :  { %v640_v49 = vpop.f32.mrf.mxu3  ;;  %v824_v26 = vpop.f32.mrf.mxu1 }
 0x136   :  { %v1054_v54 = vadd.f32 %v1609_v0, %v549_v33  ;;  %v733_v44 = vadd.f32 %v732_v50, %v640_v49 }
 0x137   :  { %779 = vmatmul.f32.gmra.mxu0 %v1439_v3 }
 0x138   :  { %1104 = vst [vmem:[#allocation9 + $0x40] sm:$0xff] %v1054_v54  ;;  %v825_v36 = vadd.f32 %v824_v26, %v733_v44  ;;  %598 = vmatmul.f32.gmra.mxu2 %v179_v62  ;;  %871 = vmatmul.f32.gmra.mxu1 %v176_v1 }
 0x13a   :  { %v1055_v63 = vadd.f32 %v1612_v4, %v825_v36  ;;  %690 = vmatmul.f32.gmra.mxu3 %v1446_v11 }
 0x13b   :  { %v551_v55 = vpop.f32.mrf.mxu2 }
 0x13c   :  { %1105 = vst [vmem:[#allocation9 + $0x48] sm:$0xff] %v1055_v63  ;;  %v552_v48 = vadd.f32 %v551_v55, %v460_v47  ;;  %v735_v35 = vpop.f32.mrf.mxu0 }
 0x13d   :  { %v643_v16 = vpop.f32.mrf.mxu3  ;;  %v827_v28 = vpop.f32.mrf.mxu1 }
 0x13e   :  { %v1056_v3 = vadd.f32 %v1609_v0, %v552_v48  ;;  %v736_v27 = vadd.f32 %v735_v35, %v643_v16 }
 0x13f   :  { %782 = vmatmul.f32.gmra.mxu0 %v1451_v13 }
 0x140   :  { %1106 = vst [vmem:[#allocation9 + $0x50] sm:$0xff] %v1056_v3  ;;  %v828_v17 = vadd.f32 %v827_v28, %v736_v27  ;;  %601 = vmatmul.f32.gmra.mxu2 %v182_v32  ;;  %874 = vmatmul.f32.gmra.mxu1 %v179_v62 }
 0x142   :  { %v1057_v11 = vadd.f32 %v1612_v4, %v828_v17  ;;  %693 = vmatmul.f32.gmra.mxu3 %v1458_v21 }
 0x143   :  { %v554_v46 = vpop.f32.mrf.mxu2 }
 0x144   :  { %1107 = vst [vmem:[#allocation9 + $0x58] sm:$0xff] %v1057_v11  ;;  %v555_v39 = vadd.f32 %v554_v46, %v463_v58  ;;  %v738_v5 = vpop.f32.mrf.mxu0  ;;  %v478_v46 = vadd.f32 %v1593_v61, %v1591_v30 }
 0x145   :  { %v646_v34 = vpop.f32.mrf.mxu3  ;;  %v830_v52 = vpop.f32.mrf.mxu1 }
 0x146   :  { %v1058_v13 = vadd.f32 %v1609_v0, %v555_v39  ;;  %v739_v12 = vadd.f32 %v738_v5, %v646_v34 }
 0x147   :  { %785 = vmatmul.f32.gmra.mxu0 %v1463_v23 }
 0x148   :  { %1108 = vst [vmem:[#allocation9 + $0x60] sm:$0xff] %v1058_v13  ;;  %v831_v1 = vadd.f32 %v830_v52, %v739_v12  ;;  %604 = vmatmul.f32.gmra.mxu2 %v185_v22  ;;  %877 = vmatmul.f32.gmra.mxu1 %v182_v32 }
 0x14a   :  { %v1059_v21 = vadd.f32 %v1612_v4, %v831_v1  ;;  %696 = vmatmul.f32.gmra.mxu3 %v1470_v29  ;;  %v481_v1 = vadd.f32 %v1601_v6, %v1599_v42 }
 0x14b   :  { %v557_v25 = vpop.f32.mrf.mxu2 }
 0x14c   :  { %1109 = vst [vmem:[#allocation9 + $0x68] sm:$0xff] %v1059_v21  ;;  %v558_v41 = vadd.f32 %v557_v25, %v466_v14  ;;  %v741_v19 = vpop.f32.mrf.mxu0 }
 0x14d   :  { %v649_v45 = vpop.f32.mrf.mxu3  ;;  %v833_v8 = vpop.f32.mrf.mxu1 }
 0x14e   :  { %v1060_v23 = vadd.f32 %v1609_v0, %v558_v41  ;;  %v742_v9 = vadd.f32 %v741_v19, %v649_v45 }
 0x14f   :  { %788 = vmatmul.f32.gmra.mxu0 %v1475_v31 }
 0x150   :  { %1110 = vst [vmem:[#allocation9 + $0x70] sm:$0xff] %v1060_v23  ;;  %v834_v33 = vadd.f32 %v833_v8, %v742_v9  ;;  %607 = vmatmul.f32.gmra.mxu2 %v188_v51  ;;  %880 = vmatmul.f32.gmra.mxu1 %v185_v22 }
 0x152   :  { %v1061_v29 = vadd.f32 %v1612_v4, %v834_v33  ;;  %699 = vmatmul.f32.gmra.mxu3 %v1482_v37 }
 0x153   :  { %v560_v15 = vpop.f32.mrf.mxu2 }
 0x154   :  { %1111 = vst [vmem:[#allocation9 + $0x78] sm:$0xff] %v1061_v29  ;;  %v561_v50 = vadd.f32 %v560_v15, %v469_v38  ;;  %v744_v49 = vpop.f32.mrf.mxu0 }
 0x155   :  { %v652_v26 = vpop.f32.mrf.mxu3  ;;  %v836_v62 = vpop.f32.mrf.mxu1 }
 0x156   :  { %v1062_v54 = vadd.f32 %v1609_v0, %v561_v50  ;;  %v745_v31 = vadd.f32 %v744_v49, %v652_v26 }
 0x157   :  { %791 = vmatmul.f32.gmra.mxu0 %v1487_v43  ;;  %v475_v43 = vadd.f32 %v1585_v40, %v1583_v20 }
 0x158   :  { %1112 = vst [vmem:[#allocation9 + $0x80] sm:$0xff] %v1062_v54  ;;  %v837_v44 = vadd.f32 %v836_v62, %v745_v31  ;;  %883 = vmatmul.f32.gmra.mxu1 %v188_v51 }
 0x15a   :  { %v1063_v53 = vadd.f32 %v1612_v4, %v837_v44 }
 0x15b   :  { %v563_v37 = vpop.f32.mrf.mxu2 }
 0x15c   :  { %1113 = vst [vmem:[#allocation9 + $0x88] sm:$0xff] %v1063_v53  ;;  %v564_v36 = vadd.f32 %v563_v37, %v472_v56  ;;  %v747_v47 = vpop.f32.mrf.mxu0 }
 0x15d   :  { %v655_v63 = vpop.f32.mrf.mxu3  ;;  %v839_v55 = vpop.f32.mrf.mxu1 }
 0x15e   :  { %v1064_v48 = vadd.f32 %v1609_v0, %v564_v36  ;;  %v748_v35 = vadd.f32 %v747_v47, %v655_v63 }
 0x160   :  { %1114 = vst [vmem:[#allocation9 + $0x90] sm:$0xff] %v1064_v48  ;;  %v840_v16 = vadd.f32 %v839_v55, %v748_v35 }
 0x162   :  { %v1065_v28 = vadd.f32 %v1612_v4, %v840_v16 }
 0x163   :  { %v566_v32 = vpop.f32.mrf.mxu2 }
 0x164   :  { %1115 = vst [vmem:[#allocation9 + $0x98] sm:$0xff] %v1065_v28  ;;  %v567_v2 = vadd.f32 %v566_v32, %v475_v43  ;;  %v750_v10 = vpop.f32.mrf.mxu0 }
 0x165   :  { %v658_v3 = vpop.f32.mrf.mxu3  ;;  %v842_v27 = vpop.f32.mrf.mxu1 }
 0x166   :  { %v1066_v17 = vadd.f32 %v1609_v0, %v567_v2  ;;  %v751_v58 = vadd.f32 %v750_v10, %v658_v3 }
 0x168   :  { %1116 = vst [vmem:[#allocation9 + $0xa0] sm:$0xff] %v1066_v17  ;;  %v843_v11 = vadd.f32 %v842_v27, %v751_v58 }
 0x16a   :  { %v1067_v39 = vadd.f32 %v1612_v4, %v843_v11 }
 0x16b   :  { %v569_v5 = vpop.f32.mrf.mxu2 }
 0x16c   :  { %1117 = vst [vmem:[#allocation9 + $0xa8] sm:$0xff] %v1067_v39  ;;  %v570_v20 = vadd.f32 %v569_v5, %v478_v46  ;;  %v753_v40 = vpop.f32.mrf.mxu0 }
 0x16d   :  { %v661_v34 = vpop.f32.mrf.mxu3  ;;  %v845_v52 = vpop.f32.mrf.mxu1 }
 0x16e   :  { %v1068_v22 = vadd.f32 %v1609_v0, %v570_v20  ;;  %v754_v13 = vadd.f32 %v753_v40, %v661_v34 }
 0x170   :  { %1118 = vst [vmem:[#allocation9 + $0xb0] sm:$0xff] %v1068_v22  ;;  %v846_v12 = vadd.f32 %v845_v52, %v754_v13  ;;  %v1732_v22 = vld [vmem:[#allocation13_spill] sm:$0xff] }
 0x172   :  { %v1069_v14 = vadd.f32 %v1612_v4, %v846_v12 }
 0x173   :  { %v572_v21 = vpop.f32.mrf.mxu2 }
 0x174   :  { %1119 = vst [vmem:[#allocation9 + $0xb8] sm:$0xff] %v1069_v14  ;;  %v573_v30 = vadd.f32 %v572_v21, %v481_v1  ;;  %v756_v61 = vpop.f32.mrf.mxu0 }
 0x175   :  { %v664_v25 = vpop.f32.mrf.mxu3  ;;  %v848_v41 = vpop.f32.mrf.mxu1 }
 0x176   :  { %v1070_v19 = vadd.f32 %v1609_v0, %v573_v30  ;;  %v757_v45 = vadd.f32 %v756_v61, %v664_v25 }
 0x178   :  { %1120 = vst [vmem:[#allocation9 + $0xc0] sm:$0xff] %v1070_v19  ;;  %v849_v8 = vadd.f32 %v848_v41, %v757_v45  ;;  %v1733_v41 = vld [vmem:[#allocation14_spill] sm:$0xff] }
 0x17a   :  { %v1071_v51 = vadd.f32 %v1612_v4, %v849_v8 }
 0x17b   :  { %v575_v23 = vpop.f32.mrf.mxu2 }
 0x17c   :  { %1121 = vst [vmem:[#allocation9 + $0xc8] sm:$0xff] %v1071_v51  ;;  %v576_v9 = vadd.f32 %v575_v23, %v1515_v60  ;;  %v759_v42 = vpop.f32.mrf.mxu0 }
 0x17d   :  { %v667_v6 = vpop.f32.mrf.mxu3  ;;  %v851_v33 = vpop.f32.mrf.mxu1 }
 0x17e   :  { %v1072_v38 = vadd.f32 %v1609_v0, %v576_v9  ;;  %v760_v29 = vadd.f32 %v759_v42, %v667_v6 }
 0x180   :  { %1122 = vst [vmem:[#allocation9 + $0xd0] sm:$0xff] %v1072_v38  ;;  %v852_v15 = vadd.f32 %v851_v33, %v760_v29  ;;  %v1734_v38 = vld [vmem:[#allocation15_spill] sm:$0xff] }
 0x182   :  { %v1073_v50 = vadd.f32 %v1612_v4, %v852_v15 }
 0x183   :  { %v578_v49 = vpop.f32.mrf.mxu2 }
 0x184   :  { %1123 = vst [vmem:[#allocation9 + $0xd8] sm:$0xff] %v1073_v50  ;;  %v579_v26 = vadd.f32 %v578_v49, %v1523_v7  ;;  %v762_v62 = vpop.f32.mrf.mxu0 }
 0x185   :  { %v670_v54 = vpop.f32.mrf.mxu3  ;;  %v854_v31 = vpop.f32.mrf.mxu1 }
 0x186   :  { %v1074_v44 = vadd.f32 %v1609_v0, %v579_v26  ;;  %v763_v60 = vadd.f32 %v762_v62, %v670_v54 }
 0x188   :  { %1124 = vst [vmem:[#allocation9 + $0xe0] sm:$0xff] %v1074_v44  ;;  %v855_v56 = vadd.f32 %v854_v31, %v763_v60  ;;  %v1735_v60 = vld [vmem:[#allocation16_spill] sm:$0xff] }
 0x18a   :  { %v1075_v53 = vadd.f32 %v1612_v4, %v855_v56 }
 0x18b   :  { %v581_v37 = vpop.f32.mrf.mxu2 }
 0x18c   :  { %1125 = vst [vmem:[#allocation9 + $0xe8] sm:$0xff] %v1075_v53  ;;  %v582_v36 = vadd.f32 %v581_v37, %v1531_v18  ;;  %v765_v47 = vpop.f32.mrf.mxu0 }
 0x18d   :  { %v673_v63 = vpop.f32.mrf.mxu3  ;;  %v857_v55 = vpop.f32.mrf.mxu1 }
 0x18e   :  { %v1076_v48 = vadd.f32 %v1609_v0, %v582_v36  ;;  %v766_v7 = vadd.f32 %v765_v47, %v673_v63 }
 0x190   :  { %1126 = vst [vmem:[#allocation9 + $0xf0] sm:$0xff] %v1076_v48  ;;  %v858_v35 = vadd.f32 %v857_v55, %v766_v7 }
 0x192   :  { %v1077_v16 = vadd.f32 %v1612_v4, %v858_v35  ;;  %v1736_v35 = vld [vmem:[#allocation17_spill] sm:$0xff] }
 0x193   :  { %v584_v43 = vpop.f32.mrf.mxu2 }
 0x194   :  { %1127 = vst [vmem:[#allocation9 + $0xf8] sm:$0xff] %v1077_v16  ;;  %v585_v28 = vadd.f32 %v584_v43, %v1539_v57  ;;  %v768_v32 = vpop.f32.mrf.mxu0 }
 0x195   :  { %v676_v2 = vpop.f32.mrf.mxu3  ;;  %v860_v10 = vpop.f32.mrf.mxu1 }
 0x196   :  { %v1078_v3 = vadd.f32 %v1609_v0, %v585_v28  ;;  %v769_v18 = vadd.f32 %v768_v32, %v676_v2 }
 0x198   :  { %1128 = vst [vmem:[#allocation9 + $0x100] sm:$0xff] %v1078_v3  ;;  %v861_v27 = vadd.f32 %v860_v10, %v769_v18 }
 0x19a   :  { %v1079_v17 = vadd.f32 %v1612_v4, %v861_v27 }
 0x19b   :  { %v587_v58 = vpop.f32.mrf.mxu2 }
 0x19c   :  { %1129 = vst [vmem:[#allocation9 + $0x108] sm:$0xff] %v1079_v17  ;;  %v588_v11 = vadd.f32 %v587_v58, %v1547_v59  ;;  %v771_v46 = vpop.f32.mrf.mxu0  ;;  %v1737_v17 = vld [vmem:[#allocation18_spill] sm:$0xff] }
 0x19d   :  { %v679_v39 = vpop.f32.mrf.mxu3  ;;  %v863_v5 = vpop.f32.mrf.mxu1 }
 0x19e   :  { %v1080_v20 = vadd.f32 %v1609_v0, %v588_v11  ;;  %v772_v57 = vadd.f32 %v771_v46, %v679_v39 }
 0x1a0   :  { %1130 = vst [vmem:[#allocation9 + $0x110] sm:$0xff] %v1080_v20  ;;  %v864_v40 = vadd.f32 %v863_v5, %v772_v57 }
 0x1a2   :  { %v1081_v34 = vadd.f32 %v1612_v4, %v864_v40 }
 0x1a3   :  { %v590_v52 = vpop.f32.mrf.mxu2 }
 0x1a4   :  { %1131 = vst [vmem:[#allocation9 + $0x118] sm:$0xff] %v1081_v34  ;;  %v591_v13 = vadd.f32 %v590_v52, %v1732_v22  ;;  %v774_v12 = vpop.f32.mrf.mxu0 }
 0x1a5   :  { %v682_v1 = vpop.f32.mrf.mxu3  ;;  %v866_v14 = vpop.f32.mrf.mxu1 }
 0x1a6   :  { %v1082_v21 = vadd.f32 %v1609_v0, %v591_v13  ;;  %v775_v59 = vadd.f32 %v774_v12, %v682_v1 }
 0x1a8   :  { %1132 = vst [vmem:[#allocation9 + $0x120] sm:$0xff] %v1082_v21  ;;  %v867_v30 = vadd.f32 %v866_v14, %v775_v59 }
 0x1aa   :  { %v1083_v61 = vadd.f32 %v1612_v4, %v867_v30 }
 0x1ab   :  { %v593_v25 = vpop.f32.mrf.mxu2 }
 0x1ac   :  { %1133 = vst [vmem:[#allocation9 + $0x128] sm:$0xff] %v1083_v61  ;;  %v594_v19 = vadd.f32 %v593_v25, %v1733_v41  ;;  %v777_v45 = vpop.f32.mrf.mxu0 }
 0x1ad   :  { %v685_v8 = vpop.f32.mrf.mxu3  ;;  %v869_v51 = vpop.f32.mrf.mxu1 }
 0x1ae   :  { %v1084_v23 = vadd.f32 %v1609_v0, %v594_v19  ;;  %v778_v9 = vadd.f32 %v777_v45, %v685_v8 }
 0x1b0   :  { %1134 = vst [vmem:[#allocation9 + $0x130] sm:$0xff] %v1084_v23  ;;  %v870_v42 = vadd.f32 %v869_v51, %v778_v9 }
 0x1b2   :  { %v1085_v6 = vadd.f32 %v1612_v4, %v870_v42 }
 0x1b3   :  { %v596_v33 = vpop.f32.mrf.mxu2 }
 0x1b4   :  { %1135 = vst [vmem:[#allocation9 + $0x138] sm:$0xff] %v1085_v6  ;;  %v597_v29 = vadd.f32 %v596_v33, %v1734_v38  ;;  %v780_v15 = vpop.f32.mrf.mxu0 }
 0x1b5   :  { %v688_v50 = vpop.f32.mrf.mxu3  ;;  %v872_v49 = vpop.f32.mrf.mxu1 }
 0x1b6   :  { %v1086_v26 = vadd.f32 %v1609_v0, %v597_v29  ;;  %v781_v62 = vadd.f32 %v780_v15, %v688_v50 }
 0x1b8   :  { %1136 = vst [vmem:[#allocation9 + $0x140] sm:$0xff] %v1086_v26  ;;  %v873_v54 = vadd.f32 %v872_v49, %v781_v62 }
 0x1ba   :  { %v1087_v31 = vadd.f32 %v1612_v4, %v873_v54 }
 0x1bb   :  { %v599_v44 = vpop.f32.mrf.mxu2 }
 0x1bc   :  { %1137 = vst [vmem:[#allocation9 + $0x148] sm:$0xff] %v1087_v31  ;;  %v600_v56 = vadd.f32 %v599_v44, %v1735_v60  ;;  %v783_v53 = vpop.f32.mrf.mxu0 }
 0x1bd   :  { %v691_v37 = vpop.f32.mrf.mxu3  ;;  %v875_v36 = vpop.f32.mrf.mxu1 }
 0x1be   :  { %v1088_v47 = vadd.f32 %v1609_v0, %v600_v56  ;;  %v784_v63 = vadd.f32 %v783_v53, %v691_v37 }
 0x1c0   :  { %1138 = vst [vmem:[#allocation9 + $0x150] sm:$0xff] %v1088_v47  ;;  %v876_v55 = vadd.f32 %v875_v36, %v784_v63 }
 0x1c2   :  { %v1089_v48 = vadd.f32 %v1612_v4, %v876_v55 }
 0x1c3   :  { %v602_v7 = vpop.f32.mrf.mxu2 }
 0x1c4   :  { %1139 = vst [vmem:[#allocation9 + $0x158] sm:$0xff] %v1089_v48  ;;  %v603_v16 = vadd.f32 %v602_v7, %v1736_v35  ;;  %v786_v43 = vpop.f32.mrf.mxu0 }
 0x1c5   :  { %v694_v28 = vpop.f32.mrf.mxu3  ;;  %v878_v32 = vpop.f32.mrf.mxu1 }
 0x1c6   :  { %v1090_v2 = vadd.f32 %v1609_v0, %v603_v16  ;;  %v787_v10 = vadd.f32 %v786_v43, %v694_v28 }
 0x1c8   :  { %1140 = vst [vmem:[#allocation9 + $0x160] sm:$0xff] %v1090_v2  ;;  %v879_v3 = vadd.f32 %v878_v32, %v787_v10 }
 0x1ca   :  { %v1091_v18 = vadd.f32 %v1612_v4, %v879_v3 }
 0x1cb   :  { %v605_v27 = vpop.f32.mrf.mxu2 }
 0x1cc   :  { %1141 = vst [vmem:[#allocation9 + $0x168] sm:$0xff] %v1091_v18  ;;  %v606_v58 = vadd.f32 %v605_v27, %v1737_v17  ;;  %v789_v11 = vpop.f32.mrf.mxu0 }
 0x1cd   :  { %v697_v46 = vpop.f32.mrf.mxu3  ;;  %v881_v39 = vpop.f32.mrf.mxu1 }
 0x1ce   :  { %v1092_v5 = vadd.f32 %v1609_v0, %v606_v58  ;;  %v790_v20 = vadd.f32 %v789_v11, %v697_v46 }
 0x1d0   :  { %1142 = vst [vmem:[#allocation9 + $0x170] sm:$0xff] %v1092_v5  ;;  %v882_v57 = vadd.f32 %v881_v39, %v790_v20 }
 0x1d2   :  { %v1093_v40 = vadd.f32 %v1612_v4, %v882_v57 }
 0x1d3   :  { %v608_v34 = vpop.f32.mrf.mxu2 }
 0x1d4   :  { %1143 = vst [vmem:[#allocation9 + $0x178] sm:$0xff] %v1093_v40  ;;  %v609_v52 = vadd.f32 %v608_v34, %v1603_v24  ;;  %v792_v22 = vpop.f32.mrf.mxu0 }
 0x1d5   :  { %v700_v13 = vpop.f32.mrf.mxu3  ;;  %v884_v12 = vpop.f32.mrf.mxu1 }
 0x1d6   :  { %v1094_v1 = vadd.f32 %v1609_v0, %v609_v52  ;;  %v793_v14 = vadd.f32 %v792_v22, %v700_v13 }
 0x1d8   :  { %1144 = vst [vmem:[#allocation9 + $0x180] sm:$0xff] %v1094_v1  ;;  %v885_v21 = vadd.f32 %v884_v12, %v793_v14 }
 0x1da   :  { %v1095_v59 = vadd.f32 %v1612_v4, %v885_v21 }
 0x1dc   :  { %1145 = vst [vmem:[#allocation9 + $0x188] sm:$0xff] %v1095_v59 }
 0x1dd   :  { %1158 = dma.vmem_to_hbm [thread:$0]  %s1151_s29, 6400, %s1153_s5, [#allocation5], %s1309_s20, %s1309_s20, %s1310_s21  }
 0x1de   :  { %1306 = dma.done.wait [#allocation5], 6400  }
 0x1df   :  { %1307 = vsyncadd [#allocation5], 4294960896 }
 0x1e0   :  { %1163 = vsyncpa [#allocation4], 1 }
 0x1e1   :  { %1164 = vsyncpa [#allocation7], 1 }
 0x1e2   :  { %1165 = vsyncpa [#allocation5], 1 }

</bundles_post_ra>
